<compile_context>
chip_gen: v6e
topology: v6e:2x2x1
jax: 0.10.0
libtpu: 0.0.40
codegen_flags: <defaults>
</compile_context>

<pallas_src>
import functools
import math

import numpy as np
import jax
import jax.numpy as jnp
from jax.experimental import pallas as pl
from jax.experimental.pallas import tpu as pltpu

_NEG_INF = -1e30            # finite "-inf": keeps the online softmax NaN-free
_VMEM_LIMIT = 32 * 1024 * 1024


def _pick_tile(n, cap, align):
  """Largest divisor of n that is <= cap and a multiple of `align` (else n)."""
  if n <= cap:
    return n
  t = cap - cap % align
  while t >= align:
    if n % t == 0:
      return t
    t -= align
  return n


# ---------------------------------------------------------------------------
# Kernel 1: RMSNorm + fused QKV projection + RoPE on q/k
#   wq/wk columns are pre-permuted to [reals | imags] (global), so RoPE is a
#   full-width rotate-half with (tS, D/2) cos/sin tables.
# ---------------------------------------------------------------------------
def _qkv_rope_kernel(x_ref, norm_ref, wq_ref, wk_ref, wv_ref, cos_ref, sin_ref,
                     q_ref, k_ref, v_ref, *, eps):
  f32 = jnp.float32
  x = x_ref[...].astype(f32)                                  # (tS, D)
  var = jnp.mean(x * x, axis=-1, keepdims=True)
  xn = (x * jax.lax.rsqrt(var + eps) * norm_ref[...].astype(f32)).astype(
      jnp.bfloat16)

  v_ref[...] = jnp.dot(xn, wv_ref[...],
                       preferred_element_type=f32).astype(v_ref.dtype)

  cos = cos_ref[...]                                          # (tS, D/2) f32
  sin = sin_ref[...]
  d2 = cos.shape[-1]

  def _project_rope(w_ref, o_ref):
    t = jnp.dot(xn, w_ref[...], preferred_element_type=f32)   # (tS, D) = [R|I]
    tr = t[:, :d2]
    ti = t[:, d2:]
    o_ref[...] = jnp.concatenate(
        [tr * cos - ti * sin, tr * sin + ti * cos], axis=-1).astype(o_ref.dtype)

  _project_rope(wq_ref, q_ref)     # scale already folded into wq on the host
  _project_rope(wk_ref, k_ref)


# ---------------------------------------------------------------------------
# Kernel 2: flash attention w/ block-diagonal segment mask (q/k pre-RoPE'd)
# ---------------------------------------------------------------------------
def _flash_attn_kernel(seg_smem_ref,
                       q_ref, k_ref, v_ref,
                       segq_ref, segk_ref,
                       o_ref,
                       m_sc, l_sc, acc_sc,
                       *, t_q, t_kv):
  f32 = jnp.float32
  b = pl.program_id(0)
  qi = pl.program_id(1)
  ki = pl.program_id(2)

  @pl.when(ki == 0)
  def _init():
    m_sc[...] = jnp.full(m_sc.shape, _NEG_INF, f32)
    l_sc[...] = jnp.zeros(l_sc.shape, f32)
    acc_sc[...] = jnp.zeros(acc_sc.shape, f32)

  # Tile-level skip: BlockDiagonalMask segments are contiguous / non-decreasing
  # along the sequence, so two tiles interact only if their id ranges overlap.
  sq_lo = seg_smem_ref[b, qi * t_q]
  sq_hi = seg_smem_ref[b, qi * t_q + t_q - 1]
  sk_lo = seg_smem_ref[b, ki * t_kv]
  sk_hi = seg_smem_ref[b, ki * t_kv + t_kv - 1]
  tiles_overlap = jnp.logical_and(sk_lo <= sq_hi, sq_lo <= sk_hi)

  @pl.when(tiles_overlap)
  def _compute():
    s = jnp.einsum('hqd,hkd->hqk', q_ref[...], k_ref[...],
                   preferred_element_type=f32)                # (H, tQ, tKV)

    mask = (segq_ref[...] == segk_ref[...])[None, :, :]       # (1, tQ, tKV)
    s = jnp.where(mask, s, _NEG_INF)

    m_prev = m_sc[...]
    m_new = jnp.maximum(m_prev, jnp.max(s, axis=-1, keepdims=True))
    p = jnp.exp(s - m_new)
    p = jnp.where(mask, p, 0.0)          # rows fully masked within this tile
    alpha = jnp.exp(m_prev - m_new)
    l_sc[...] = alpha * l_sc[...] + jnp.sum(p, axis=-1, keepdims=True)
    acc_sc[...] = alpha * acc_sc[...] + jnp.einsum(
        'hqk,hkd->hqd', p.astype(jnp.bfloat16), v_ref[...],
        preferred_element_type=f32)
    m_sc[...] = m_new

  @pl.when(ki == pl.num_programs(2) - 1)
  def _finalize():
    inv_l = pl.reciprocal(l_sc[...], approx=True)
    o_ref[...] = (acc_sc[...] * inv_l).astype(o_ref.dtype)


# ---------------------------------------------------------------------------
# Kernel 3: output proj + residual + RMSNorm + SwiGLU FFN (F-tiled) + residual
# ---------------------------------------------------------------------------
def _out_ffn_kernel(x_ref, o_ref, wo_ref, norm_ref, w1_ref, w3_ref, w2_ref,
                    out_ref, h_sc, hn_sc, acc_sc, *, eps):
  f32 = jnp.float32
  fi = pl.program_id(2)

  @pl.when(fi == 0)
  def _prologue():
    attn = jnp.dot(o_ref[...], wo_ref[...], preferred_element_type=f32)
    h = x_ref[...].astype(f32) + attn
    h_sc[...] = h
    var = jnp.mean(h * h, axis=-1, keepdims=True)
    hn = h * jax.lax.rsqrt(var + eps) * norm_ref[...].astype(f32)
    hn_sc[...] = hn.astype(jnp.bfloat16)
    acc_sc[...] = jnp.zeros(acc_sc.shape, f32)

  hn = hn_sc[...]
  g = jnp.dot(hn, w1_ref[...], preferred_element_type=f32)
  u = jnp.dot(hn, w3_ref[...], preferred_element_type=f32)
  act = (g * jax.nn.sigmoid(g) * u).astype(jnp.bfloat16)     # SiLU(g) * u
  acc_sc[...] += jnp.dot(act, w2_ref[...], preferred_element_type=f32)

  @pl.when(fi == pl.num_programs(2) - 1)
  def _epilogue():
    out_ref[...] = (h_sc[...] + acc_sc[...]).astype(out_ref.dtype)


# ---------------------------------------------------------------------------
# Wrapper
# ---------------------------------------------------------------------------
def transformer_block(x, seg_ids, freqs_cos, freqs_sin, params, *, n_heads,
                      eps=1e-5, token_tile=256, kv_tile=256, ffn_tile=512):
  """One pixtral vision TransformerBlock forward.

  x:           (B, S, D) activations.
  seg_ids:     (B, S) int image id per patch (BlockDiagonalMask equivalent);
               must be non-decreasing along S (contiguous images).
  freqs_cos/freqs_sin: (S, head_dim // 2) real/imag parts of freqs_cis.
  params:      weights; linear layers pre-transposed to (in_features, out_features).
  """
  B, S, D = x.shape
  H = n_heads
  assert D % H == 0
  hd = D // H
  assert hd % 2 == 0
  h2 = hd // 2
  D2 = D // 2
  F = params['w1'].shape[1]
  scale = 1.0 / math.sqrt(hd)
  bf16 = jnp.bfloat16
  f32 = jnp.float32

  tS = _pick_tile(S, token_tile, 8)       # token tile (q rows / ffn rows)
  tKV = _pick_tile(S, kv_tile, 128)       # kv tile (lane-dense: 128-aligned or == S)
  tF = _pick_tile(F, ffn_tile, 128)       # FFN intermediate tile
  assert S % tS == 0 and S % tKV == 0 and F % tF == 0

  # ---- one-time host-side prep (in production this folds into weight loading) --
  # Permute wq/wk output columns so q/k come out as [all reals | all imags]
  # (per-head order preserved inside each half).  RoPE then becomes one
  # full-width complex rotation in kernel 1, and attention scores are invariant
  # because the same within-head permutation is applied to both q and k.
  perm = np.concatenate([
      np.concatenate([np.arange(h * hd, (h + 1) * hd, 2) for h in range(H)]),
      np.concatenate([np.arange(h * hd + 1, (h + 1) * hd, 2) for h in range(H)]),
  ])
  wq = (jnp.asarray(params['wq']) * scale)[:, perm].astype(bf16)  # scale folded in
  wk = jnp.asarray(params['wk'])[:, perm].astype(bf16)
  wv = jnp.asarray(params['wv']).astype(bf16)
  wo = jnp.asarray(params['wo']).astype(bf16)
  w1 = jnp.asarray(params['w1']).astype(bf16)
  w2 = jnp.asarray(params['w2']).astype(bf16)
  w3 = jnp.asarray(params['w3']).astype(bf16)
  attn_norm = jnp.asarray(params['attn_norm']).reshape(1, D).astype(f32)
  ffn_norm = jnp.asarray(params['ffn_norm']).reshape(1, D).astype(f32)
  # (S, D/2) cos/sin matching the [reals | imags] half layout (same per head).
  cos_half = jnp.tile(jnp.asarray(freqs_cos).astype(f32), (1, H))
  sin_half = jnp.tile(jnp.asarray(freqs_sin).astype(f32), (1, H))

  seg = seg_ids.astype(jnp.int32)                 # (B, S)
  seg_col = seg.reshape(B, S, 1)
  seg_row = seg.reshape(B, 1, S)

  # ---------------- kernel 1: RMSNorm + QKV projection + RoPE ----------------
  q, k, v = pl.pallas_call(
      functools.partial(_qkv_rope_kernel, eps=eps),
      out_shape=(jax.ShapeDtypeStruct((B, S, D), bf16),
                 jax.ShapeDtypeStruct((B, S, D), bf16),
                 jax.ShapeDtypeStruct((B, S, D), bf16)),
      grid_spec=pltpu.PrefetchScalarGridSpec(
          num_scalar_prefetch=0,
          grid=(B, S // tS),
          in_specs=[
              pl.BlockSpec((None, tS, D), lambda b, s: (b, s, 0)),   # x
              pl.BlockSpec((1, D), lambda b, s: (0, 0)),             # attention_norm
              pl.BlockSpec((D, D), lambda b, s: (0, 0)),             # wq (permuted, scaled)
              pl.BlockSpec((D, D), lambda b, s: (0, 0)),             # wk (permuted)
              pl.BlockSpec((D, D), lambda b, s: (0, 0)),             # wv
              pl.BlockSpec((tS, D2), lambda b, s: (s, 0)),           # cos
              pl.BlockSpec((tS, D2), lambda b, s: (s, 0)),           # sin
          ],
          out_specs=(pl.BlockSpec((None, tS, D), lambda b, s: (b, s, 0)),
                     pl.BlockSpec((None, tS, D), lambda b, s: (b, s, 0)),
                     pl.BlockSpec((None, tS, D), lambda b, s: (b, s, 0))),
      ),
      compiler_params=pltpu.CompilerParams(
          dimension_semantics=("parallel", "parallel"),
          vmem_limit_bytes=_VMEM_LIMIT),
  )(x, attn_norm, wq, wk, wv, cos_half, sin_half)

  # layout plumbing: split heads (pure XLA transposes).
  # q/k are in [reals | imags] global layout -> per-head [reals | imags].
  def split_qk(t):
    return t.reshape(B, S, 2, H, h2).transpose(0, 3, 1, 2, 4).reshape(B, H, S, hd)

  def split_v(t):
    return t.reshape(B, S, H, hd).transpose(0, 2, 1, 3)

  qh, kh, vh = split_qk(q), split_qk(k), split_v(v)

  # ---------------- kernel 2: flash attention ----------------
  o_heads = pl.pallas_call(
      functools.partial(_flash_attn_kernel, t_q=tS, t_kv=tKV),
      out_shape=jax.ShapeDtypeStruct((B, H, S, hd), bf16),
      grid_spec=pltpu.PrefetchScalarGridSpec(
          num_scalar_prefetch=1,              # seg ids -> SMEM for tile skipping
          grid=(B, S // tS, S // tKV),
          in_specs=[
              pl.BlockSpec((None, H, tS, hd), lambda b, qi, ki, seg: (b, 0, qi, 0)),   # q
              pl.BlockSpec((None, H, tKV, hd), lambda b, qi, ki, seg: (b, 0, ki, 0)),  # k
              pl.BlockSpec((None, H, tKV, hd), lambda b, qi, ki, seg: (b, 0, ki, 0)),  # v
              pl.BlockSpec((None, tS, 1), lambda b, qi, ki, seg: (b, qi, 0)),          # seg (q rows)
              pl.BlockSpec((None, 1, tKV), lambda b, qi, ki, seg: (b, 0, ki)),         # seg (kv cols)
          ],
          out_specs=pl.BlockSpec((None, H, tS, hd),
                                 lambda b, qi, ki, seg: (b, 0, qi, 0)),
          scratch_shapes=[
              pltpu.VMEM((H, tS, 1), f32),    # running max
              pltpu.VMEM((H, tS, 1), f32),    # running denominator
              pltpu.VMEM((H, tS, hd), f32),   # output accumulator
          ],
      ),
      compiler_params=pltpu.CompilerParams(
          dimension_semantics=("parallel", "parallel", "arbitrary"),
          vmem_limit_bytes=_VMEM_LIMIT),
  )(seg, qh, kh, vh, seg_col, seg_row)

  o = o_heads.transpose(0, 2, 1, 3).reshape(B, S, D)          # merge heads

  # ---------------- kernel 3: wo + residual + RMSNorm + SwiGLU FFN ----------------
  out = pl.pallas_call(
      functools.partial(_out_ffn_kernel, eps=eps),
      out_shape=jax.ShapeDtypeStruct((B, S, D), x.dtype),
      grid_spec=pltpu.PrefetchScalarGridSpec(
          num_scalar_prefetch=0,
          grid=(B, S // tS, F // tF),
          in_specs=[
              pl.BlockSpec((None, tS, D), lambda b, s, f: (b, s, 0)),  # x (residual)
              pl.BlockSpec((None, tS, D), lambda b, s, f: (b, s, 0)),  # attention output
              pl.BlockSpec((D, D), lambda b, s, f: (0, 0)),            # wo
              pl.BlockSpec((1, D), lambda b, s, f: (0, 0)),            # ffn_norm
              pl.BlockSpec((D, tF), lambda b, s, f: (0, f)),           # w1 tile
              pl.BlockSpec((D, tF), lambda b, s, f: (0, f)),           # w3 tile
              pl.BlockSpec((tF, D), lambda b, s, f: (f, 0)),           # w2 tile
          ],
          out_specs=pl.BlockSpec((None, tS, D), lambda b, s, f: (b, s, 0)),
          scratch_shapes=[
              pltpu.VMEM((tS, D), f32),       # h = x + attn_out
              pltpu.VMEM((tS, D), bf16),      # rmsnorm(h) in bf16 for the MXU
              pltpu.VMEM((tS, D), f32),       # FFN accumulator over F tiles
          ],
      ),
      compiler_params=pltpu.CompilerParams(
          dimension_semantics=("parallel", "parallel", "arbitrary"),
          vmem_limit_bytes=_VMEM_LIMIT),
  )(x, o, wo, ffn_norm, w1, w3, w2)

  return out


# ---------------------------------------------------------------------------
# Pure numpy reference following the PyTorch module exactly
# ---------------------------------------------------------------------------
def _reference_block(x, seg_ids, cos, sin, p, n_heads, eps=1e-5):
  B, S, D = x.shape
  hd = D // n_heads

  def rmsnorm(v, w):
    var = np.mean(v * v, axis=-1, keepdims=True)
    return v / np.sqrt(var + eps) * w

  xn = rmsnorm(x, p['attn_norm'])
  q = (xn @ p['wq']).reshape(B, S, n_heads, hd)
  k = (xn @ p['wk']).reshape(B, S, n_heads, hd)
  v = (xn @ p['wv']).reshape(B, S, n_heads, hd)

  def rope(t):
    tr = t[..., 0::2]
    ti = t[..., 1::2]
    c = cos[None, :, None, :]
    s = sin[None, :, None, :]
    o_r = tr * c - ti * s
    o_i = tr * s + ti * c
    return np.stack([o_r, o_i], axis=-1).reshape(B, S, n_heads, hd)

  q = rope(q)
  k = rope(k)
  scale = 1.0 / math.sqrt(hd)
  scores = np.einsum('bqhd,bkhd->bhqk', q, k) * scale
  allowed = seg_ids[:, None, :, None] == seg_ids[:, None, None, :]  # (B,1,S,S)
  scores = np.where(allowed, scores, -np.inf)
  scores = scores - scores.max(-1, keepdims=True)
  e = np.exp(scores)
  attn = e / e.sum(-1, keepdims=True)
  o = np.einsum('bhqk,bkhd->bqhd', attn, v).reshape(B, S, D)
  h = x + o @ p['wo']

  hn = rmsnorm(h, p['ffn_norm'])
  g = hn @ p['w1']
  u = hn @ p['w3']
  sig = 1.0 / (1.0 + np.exp(-g))
  ff = (g * sig * u) @ p['w2']
  return h + ff


if __name__ == "__main__":
  # Small but tiling-exercising shapes: 2 q-tiles x 2 kv-tiles x 2 FFN tiles,
  # with segment boundaries both tile-aligned (batch 0) and unaligned (batch 1).
  B, S = 2, 256          # batch, patches
  D, F_, H = 64, 256, 2  # hidden_size, intermediate_size, num_attention_heads
  hd = D // H
  theta = 10000.0

  key = jax.random.PRNGKey(0)
  keys = jax.random.split(key, 10)
  x = jax.random.normal(keys[0], (B, S, D), jnp.float32)
  wstd = 0.02
  params = {
      'attn_norm': jnp.ones((D,), jnp.float32) + 0.01 * jax.random.normal(keys[1], (D,), jnp.float32),
      'ffn_norm':  jnp.ones((D,), jnp.float32) + 0.01 * jax.random.normal(keys[2], (D,), jnp.float32),
      'wq': wstd * jax.random.normal(keys[3], (D, D), jnp.float32),
      'wk': wstd * jax.random.normal(keys[4], (D, D), jnp.float32),
      'wv': wstd * jax.random.normal(keys[5], (D, D), jnp.float32),
      'wo': wstd * jax.random.normal(keys[6], (D, D), jnp.float32),
      'w1': wstd * jax.random.normal(keys[7], (D, F_), jnp.float32),
      'w2': wstd * jax.random.normal(keys[8], (F_, D), jnp.float32),
      'w3': wstd * jax.random.normal(keys[9], (D, F_), jnp.float32),
  }

  # freqs_cis = cos(angles) + i*sin(angles), shape (S, head_dim // 2)
  inv_freq = 1.0 / (theta ** (np.arange(0, hd, 2, dtype=np.float32) / hd))
  pos = np.arange(S, dtype=np.float32)
  angles = np.outer(pos, inv_freq)                          # (S, hd // 2)
  cos_hd = jnp.asarray(np.cos(angles), jnp.float32)
  sin_hd = jnp.asarray(np.sin(angles), jnp.float32)

  # BlockDiagonalMask equivalent: per-token contiguous segment ("image") ids
  seg0 = np.concatenate([np.full(128, 0), np.full(128, 1)])
  seg1 = np.concatenate([np.full(100, 0), np.full(60, 1), np.full(96, 2)])
  seg_ids = jnp.asarray(np.stack([seg0, seg1]).astype(np.int32))

  out = transformer_block(x, seg_ids, cos_hd, sin_hd, params, n_heads=H,
                          token_tile=128, kv_tile=128, ffn_tile=128)
  out = jax.block_until_ready(out)

  ref = _reference_block(np.asarray(x), np.asarray(seg_ids),
                         np.asarray(cos_hd), np.asarray(sin_hd),
                         {k: np.asarray(v) for k, v in params.items()},
                         n_heads=H)
  np.testing.assert_allclose(np.asarray(out), ref, rtol=2e-2, atol=2e-2)
  print("KERNEL_OK")
</pallas_src>

<mosaic_0001>
module attributes {stable_mosaic.version = 11 : i64} {
  func.func @_qkv_rope_kernel(%arg0: i32, %arg1: i32, %arg2: memref<1x128x64xf32, #tpu.memory_space<vmem>>, %arg3: memref<1x64xf32, #tpu.memory_space<vmem>>, %arg4: memref<64x64xbf16, #tpu.memory_space<vmem>>, %arg5: memref<64x64xbf16, #tpu.memory_space<vmem>>, %arg6: memref<64x64xbf16, #tpu.memory_space<vmem>>, %arg7: memref<128x32xf32, #tpu.memory_space<vmem>>, %arg8: memref<128x32xf32, #tpu.memory_space<vmem>>, %arg9: memref<1x128x64xbf16, #tpu.memory_space<vmem>>, %arg10: memref<1x128x64xbf16, #tpu.memory_space<vmem>>, %arg11: memref<1x128x64xbf16, #tpu.memory_space<vmem>>) attributes {dimension_semantics = [#tpu.dimension_semantics<parallel>, #tpu.dimension_semantics<parallel>], iteration_bounds = array<i64: 2, 2>, scalar_prefetch = 0 : i64, scratch_operands = 0 : i64, tpu.core_type = #tpu.core_type<tc>, window_params = [{transform_indices = @transform_0, window_bounds = array<i64: 1, 128, 64>}, {pipeline_mode = #tpu.pipeline_mode<synchronous>, transform_indices = @transform_1, window_bounds = array<i64: 1, 64>}, {pipeline_mode = #tpu.pipeline_mode<synchronous>, transform_indices = @transform_2, window_bounds = array<i64: 64, 64>}, {pipeline_mode = #tpu.pipeline_mode<synchronous>, transform_indices = @transform_3, window_bounds = array<i64: 64, 64>}, {pipeline_mode = #tpu.pipeline_mode<synchronous>, transform_indices = @transform_4, window_bounds = array<i64: 64, 64>}, {transform_indices = @transform_5, window_bounds = array<i64: 128, 32>}, {transform_indices = @transform_6, window_bounds = array<i64: 128, 32>}, {transform_indices = @transform_7, window_bounds = array<i64: 1, 128, 64>}, {transform_indices = @transform_8, window_bounds = array<i64: 1, 128, 64>}, {transform_indices = @transform_9, window_bounds = array<i64: 1, 128, 64>}]} {
    %c0 = arith.constant 0 : index
    %c0_0 = arith.constant 0 : index
    %c0_1 = arith.constant 0 : index
    %0 = vector.load %arg2[%c0, %c0_0, %c0_1] : memref<1x128x64xf32, #tpu.memory_space<vmem>>, vector<1x128x64xf32>
    %1 = vector.shape_cast %0 : vector<1x128x64xf32> to vector<128x64xf32>
    %2 = arith.mulf %1, %1 : vector<128x64xf32>
    %cst = arith.constant dense<0.000000e+00> : vector<128xf32>
    %3 = vector.multi_reduction <add>, %2, %cst [1] : vector<128x64xf32> to vector<128xf32>
    %4 = vector.shape_cast %3 : vector<128xf32> to vector<128x1xf32>
    %cst_2 = arith.constant 6.400000e+01 : f32
    %5 = vector.broadcast %cst_2 : f32 to vector<128x1xf32>
    %6 = arith.divf %4, %5 : vector<128x1xf32>
    %cst_3 = arith.constant 9.99999974E-6 : f32
    %7 = vector.broadcast %cst_3 : f32 to vector<128x1xf32>
    %8 = arith.addf %6, %7 : vector<128x1xf32>
    %9 = math.rsqrt %8 : vector<128x1xf32>
    %10 = vector.broadcast %9 : vector<128x1xf32> to vector<128x64xf32>
    %11 = arith.mulf %1, %10 : vector<128x64xf32>
    %c0_4 = arith.constant 0 : index
    %c0_5 = arith.constant 0 : index
    %12 = vector.load %arg3[%c0_4, %c0_5] : memref<1x64xf32, #tpu.memory_space<vmem>>, vector<1x64xf32>
    %13 = vector.broadcast %12 : vector<1x64xf32> to vector<128x64xf32>
    %14 = arith.mulf %11, %13 : vector<128x64xf32>
    %15 = arith.truncf %14 : vector<128x64xf32> to vector<128x64xbf16>
    %c0_6 = arith.constant 0 : index
    %c0_7 = arith.constant 0 : index
    %16 = vector.load %arg6[%c0_6, %c0_7] : memref<64x64xbf16, #tpu.memory_space<vmem>>, vector<64x64xbf16>
    %cst_8 = arith.constant dense<0.000000e+00> : vector<128x64xf32>
    %17 = tpu.matmul %15, %16, %cst_8 {dimension_numbers = #tpu.dot_dimension_numbers<[1], [0], [0], [1], [0, 0, 1, 1], [], []>} : vector<128x64xbf16>, vector<64x64xbf16>, vector<128x64xf32> -> vector<128x64xf32>
    %18 = arith.truncf %17 : vector<128x64xf32> to vector<128x64xbf16>
    %c0_9 = arith.constant 0 : index
    %c0_10 = arith.constant 0 : index
    %c0_11 = arith.constant 0 : index
    %19 = vector.load %arg11[%c0_9, %c0_10, %c0_11] : memref<1x128x64xbf16, #tpu.memory_space<vmem>>, vector<1x128x64xbf16>
    %20 = vector.shape_cast %19 : vector<1x128x64xbf16> to vector<128x64xbf16>
    %21 = vector.shape_cast %18 : vector<128x64xbf16> to vector<1x128x64xbf16>
    tpu.vector_store %arg11[%c0_9, %c0_10, %c0_11], %21 {strides = array<i32>} : memref<1x128x64xbf16, #tpu.memory_space<vmem>>, vector<1x128x64xbf16>,
    %c0_12 = arith.constant 0 : index
    %c0_13 = arith.constant 0 : index
    %22 = vector.load %arg7[%c0_12, %c0_13] : memref<128x32xf32, #tpu.memory_space<vmem>>, vector<128x32xf32>
    %c0_14 = arith.constant 0 : index
    %c0_15 = arith.constant 0 : index
    %23 = vector.load %arg8[%c0_14, %c0_15] : memref<128x32xf32, #tpu.memory_space<vmem>>, vector<128x32xf32>
    %c0_16 = arith.constant 0 : index
    %c0_17 = arith.constant 0 : index
    %24 = vector.load %arg4[%c0_16, %c0_17] : memref<64x64xbf16, #tpu.memory_space<vmem>>, vector<64x64xbf16>
    %cst_18 = arith.constant dense<0.000000e+00> : vector<128x64xf32>
    %25 = tpu.matmul %15, %24, %cst_18 {dimension_numbers = #tpu.dot_dimension_numbers<[1], [0], [0], [1], [0, 0, 1, 1], [], []>} : vector<128x64xbf16>, vector<64x64xbf16>, vector<128x64xf32> -> vector<128x64xf32>
    %26 = vector.extract_strided_slice %25 {offsets = [0, 0], sizes = [128, 32], strides = [1, 1]} : vector<128x64xf32> to vector<128x32xf32>
    %27 = vector.extract_strided_slice %25 {offsets = [0, 32], sizes = [128, 32], strides = [1, 1]} : vector<128x64xf32> to vector<128x32xf32>
    %28 = arith.mulf %26, %22 : vector<128x32xf32>
    %29 = arith.mulf %27, %23 : vector<128x32xf32>
    %30 = arith.subf %28, %29 : vector<128x32xf32>
    %31 = arith.mulf %26, %23 : vector<128x32xf32>
    %32 = arith.mulf %27, %22 : vector<128x32xf32>
    %33 = arith.addf %31, %32 : vector<128x32xf32>
    %34 = tpu.concatenate %30, %33 in 1 : vector<128x32xf32>, vector<128x32xf32> -> vector<128x64xf32>
    %35 = arith.truncf %34 : vector<128x64xf32> to vector<128x64xbf16>
    %c0_19 = arith.constant 0 : index
    %c0_20 = arith.constant 0 : index
    %c0_21 = arith.constant 0 : index
    %36 = vector.load %arg9[%c0_19, %c0_20, %c0_21] : memref<1x128x64xbf16, #tpu.memory_space<vmem>>, vector<1x128x64xbf16>
    %37 = vector.shape_cast %36 : vector<1x128x64xbf16> to vector<128x64xbf16>
    %38 = vector.shape_cast %35 : vector<128x64xbf16> to vector<1x128x64xbf16>
    tpu.vector_store %arg9[%c0_19, %c0_20, %c0_21], %38 {strides = array<i32>} : memref<1x128x64xbf16, #tpu.memory_space<vmem>>, vector<1x128x64xbf16>,
    %c0_22 = arith.constant 0 : index
    %c0_23 = arith.constant 0 : index
    %39 = vector.load %arg5[%c0_22, %c0_23] : memref<64x64xbf16, #tpu.memory_space<vmem>>, vector<64x64xbf16>
    %cst_24 = arith.constant dense<0.000000e+00> : vector<128x64xf32>
    %40 = tpu.matmul %15, %39, %cst_24 {dimension_numbers = #tpu.dot_dimension_numbers<[1], [0], [0], [1], [0, 0, 1, 1], [], []>} : vector<128x64xbf16>, vector<64x64xbf16>, vector<128x64xf32> -> vector<128x64xf32>
    %41 = vector.extract_strided_slice %40 {offsets = [0, 0], sizes = [128, 32], strides = [1, 1]} : vector<128x64xf32> to vector<128x32xf32>
    %42 = vector.extract_strided_slice %40 {offsets = [0, 32], sizes = [128, 32], strides = [1, 1]} : vector<128x64xf32> to vector<128x32xf32>
    %43 = arith.mulf %41, %22 : vector<128x32xf32>
    %44 = arith.mulf %42, %23 : vector<128x32xf32>
    %45 = arith.subf %43, %44 : vector<128x32xf32>
    %46 = arith.mulf %41, %23 : vector<128x32xf32>
    %47 = arith.mulf %42, %22 : vector<128x32xf32>
    %48 = arith.addf %46, %47 : vector<128x32xf32>
    %49 = tpu.concatenate %45, %48 in 1 : vector<128x32xf32>, vector<128x32xf32> -> vector<128x64xf32>
    %50 = arith.truncf %49 : vector<128x64xf32> to vector<128x64xbf16>
    %c0_25 = arith.constant 0 : index
    %c0_26 = arith.constant 0 : index
    %c0_27 = arith.constant 0 : index
    %51 = vector.load %arg10[%c0_25, %c0_26, %c0_27] : memref<1x128x64xbf16, #tpu.memory_space<vmem>>, vector<1x128x64xbf16>
    %52 = vector.shape_cast %51 : vector<1x128x64xbf16> to vector<128x64xbf16>
    %53 = vector.shape_cast %50 : vector<128x64xbf16> to vector<1x128x64xbf16>
    tpu.vector_store %arg10[%c0_25, %c0_26, %c0_27], %53 {strides = array<i32>} : memref<1x128x64xbf16, #tpu.memory_space<vmem>>, vector<1x128x64xbf16>,
    return
  }
  func.func @transform_0(%arg0: i32, %arg1: i32) -> (i32, i32, i32) {
    %c0_i32 = arith.constant 0 : i32
    %c0_i32_0 = arith.constant 0 : i32
    return %arg0, %arg1, %c0_i32 : i32, i32, i32
  }
  func.func @transform_1(%arg0: i32, %arg1: i32) -> (i32, i32) {
    %c0_i32 = arith.constant 0 : i32
    %c0_i32_0 = arith.constant 0 : i32
    %c0_i32_1 = arith.constant 0 : i32
    return %c0_i32, %c0_i32_0 : i32, i32
  }
  func.func @transform_2(%arg0: i32, %arg1: i32) -> (i32, i32) {
    %c0_i32 = arith.constant 0 : i32
    %c0_i32_0 = arith.constant 0 : i32
    %c0_i32_1 = arith.constant 0 : i32
    return %c0_i32, %c0_i32_0 : i32, i32
  }
  func.func @transform_3(%arg0: i32, %arg1: i32) -> (i32, i32) {
    %c0_i32 = arith.constant 0 : i32
    %c0_i32_0 = arith.constant 0 : i32
    %c0_i32_1 = arith.constant 0 : i32
    return %c0_i32, %c0_i32_0 : i32, i32
  }
  func.func @transform_4(%arg0: i32, %arg1: i32) -> (i32, i32) {
    %c0_i32 = arith.constant 0 : i32
    %c0_i32_0 = arith.constant 0 : i32
    %c0_i32_1 = arith.constant 0 : i32
    return %c0_i32, %c0_i32_0 : i32, i32
  }
  func.func @transform_5(%arg0: i32, %arg1: i32) -> (i32, i32) {
    %c0_i32 = arith.constant 0 : i32
    %c0_i32_0 = arith.constant 0 : i32
    return %arg1, %c0_i32 : i32, i32
  }
  func.func @transform_6(%arg0: i32, %arg1: i32) -> (i32, i32) {
    %c0_i32 = arith.constant 0 : i32
    %c0_i32_0 = arith.constant 0 : i32
    return %arg1, %c0_i32 : i32, i32
  }
  func.func @transform_7(%arg0: i32, %arg1: i32) -> (i32, i32, i32) {
    %c0_i32 = arith.constant 0 : i32
    %c0_i32_0 = arith.constant 0 : i32
    return %arg0, %arg1, %c0_i32 : i32, i32, i32
  }
  func.func @transform_8(%arg0: i32, %arg1: i32) -> (i32, i32, i32) {
    %c0_i32 = arith.constant 0 : i32
    %c0_i32_0 = arith.constant 0 : i32
    return %arg0, %arg1, %c0_i32 : i32, i32, i32
  }
  func.func @transform_9(%arg0: i32, %arg1: i32) -> (i32, i32, i32) {
    %c0_i32 = arith.constant 0 : i32
    %c0_i32_0 = arith.constant 0 : i32
    return %arg0, %arg1, %c0_i32 : i32, i32, i32
  }
}

</mosaic_0001>

<bundles_post_ra>
// kernel: tpu_custom_call.1
= control target key start
LH: loop header
LB: loop body
LE: loop exit
PB: predicated region body
PF: predicated region fallthrough
CT: control target
= control target key end

     0   :  { %s2832_s30 = smov 0   ;;  %s2834_s10 = smov 0   ;;  %s4006_s0 = inlined_call_operand.vmem [shape: f32[2,256,64], index: 0, kind: input, shape index: {}]   ;;  %s4007_s1 = inlined_call_operand.vmem [shape: f32[1,64], index: 1, kind: input, shape index: {}]   ;;  %s4008_s2 = inlined_call_operand.vmem [shape: bf16[64,64], index: 2, kind: input, shape index: {}]   ;;  %s4009_s3 = inlined_call_operand.vmem [shape: bf16[64,64], index: 3, kind: input, shape index: {}]   ;;  %s4010_s4 = inlined_call_operand.vmem [shape: bf16[64,64], index: 4, kind: input, shape index: {}]   ;;  %s4011_s5 = inlined_call_operand.vmem [shape: f32[256,32], index: 5, kind: input, shape index: {}]   ;;  %s4012_s6 = inlined_call_operand.vmem [shape: f32[256,32], index: 6, kind: input, shape index: {}]   ;;  %s4013_s7 = inlined_call_operand.vmem [shape: bf16[2,256,64], index: 7, kind: output, shape index: {0}]   ;;  %s4014_s8 = inlined_call_operand.vmem [shape: bf16[2,256,64], index: 8, kind: output, shape index: {1}]   ;;  %s4015_s9 = inlined_call_operand.vmem [shape: bf16[2,256,64], index: 9, kind: output, shape index: {2}]  }
   0x1   :  { %s2836_s11 = smov 0   ;;  %s2838_s12 = smov 0  }
   0x2   :  { %s2840_s13 = smov 0  }
   0x3 LB: > { %s29_s14 = sadd.s32 1, %s2770_s11  ;;  %s32_s15 = sadd.s32 1, %s2774_s12  ;;  %s2778_s13 = sphi %s2840_s13, %s20_s13   ;;  %s2774_s12 = sphi %s2838_s12, %s4113_s12   ;;  %s2770_s11 = sphi %s2836_s11, %s4112_s11   ;;  %s2766_s10 = sphi %s2834_s10, %s4111_s10   ;;  %s2762_s30 = sphi %s2832_s30, %s4110_s30  }
   0x4   : > { %p30_p0 = scmp.ge.s32.totalorder %s29_s14, 2  ;;  %p2280_p1 = scmp.ge.s32.totalorder %s2778_s13, 1 }
   0x5   : > { %p339_p2 = scmp.lt.s32.totalorder %s2778_s13, 5 }
   0x6   : > { %s4115_s14 = smov (%p30_p0, %s29_s14), 0  ;;  %s4117_s15 = smov (!%p30_p0, %s32_s15), %s2774_s12 }
   0x7   : > { %p340_p3 = pnand %p2280_p1, %p339_p2  ;;  %p34_p4 = scmp.ge.s32.totalorder %s4117_s15, 2 }
   0x9   : > { %s4119_s15 = smov (%p34_p4, %s4117_s15), 0  ;;  %343 = sbr.rel (%p340_p3) target bundleno = 759 (0x2f7), region = 48 }
   0xe   : > { %s2281_s16 = sshll.u32 %s2762_s30, 4  ;;  %p412_p5 = scmp.lt.s32.totalorder %s2766_s10, 1  ;;  %vm496_vm0 = vcmask 523264   ;;  %v2670_v48 = vld [vmem:[%s4010_s4 + $0x18] sm:$0xff]   ;;  %v2671_v49 = vld [vmem:[%s4010_s4 + $0x10] sm:$0xff]   ;;  %v2672_v50 = vld [vmem:[%s4010_s4 + $0x8] sm:$0xff]  }
   0xf   : > { %p414_p6 = scmp.lt.s32.totalorder %s2281_s16, 31  ;;  %2468 = vmatprep.subr.bf16.mxu0 %v2670_v48  ;;  %2540 = vmatprep.subr.bf16.mxu1 %v2670_v48  ;;  %v2673_v51 = vld [vmem:[%s4010_s4] sm:$0xff]   ;;  %v2984_v52 = vld [vmem:[%s4009_s3 + $0x18] sm:$0xff]   ;;  %s2780_s25 = smov 32   ;;  %vm858_vm1 = vcmask 519168   ;;  %vm1452_vm2 = vcmask 261120  }
  0x10   : > { %s4121_s10 = smov (!%p412_p5, %s2766_s10), 1  ;;  %2469 = vmatpush3.bf16.msra.mxu0 %v2670_v48  ;;  %2544 = vmatpush3.bf16.msra.mxu1 %v2670_v48  ;;  %v2990_v53 = vld [vmem:[%s4008_s2 + $0x18] sm:$0xff]  }
  0x11   : > { %s4123_s16 = smov (!%p414_p6, %s2281_s16), 31  ;;  %s2282_s17 = sshll.u32 %s4121_s10, 5  ;;  %2470 = vmatprep.subr.bf16.mxu0 %v2671_v49  ;;  %2541 = vmatprep.subr.bf16.mxu1 %v2671_v49 }
  0x12   : > { %s2865_s18 = sadd.s32 %s2282_s17, %s4123_s16  ;;  %s2285_s21 = sshll.u32 %s4123_s16, 3 }
  0x13   : > { %s2283_s19 = sshll.u32 %s2865_s18, 3  ;;  %s2999_s24 = scalar_lea.vmem %s4012_s6, %s2285_s21 }
  0x14   : > { %s2871_s22 = scalar_lea.vmem %s4006_s0, %s2283_s19  ;;  %2471 = vmatpush3.bf16.msra.mxu0 %v2671_v49  ;;  %2545 = vmatpush3.bf16.msra.mxu1 %v2671_v49  ;;  %v3002_v54 = vld [vmem:[%s2999_s24 + $0x8] sm:$0xff]  ;;  %v3005_v55 = vld [vmem:[%s2999_s24] sm:$0xff]  ;;  %v3012_v56 = vld [vmem:[%s2999_s24 + $0x10] sm:$0xff]  ;;  %s3044_s28 = scalar_lea.vmem %s4011_s5, %s2285_s21 }
  0x15   : > { %v2874_v0 = vld [vmem:[%s2871_s22 + $0x40] sm:$0xff]  ;;  %v2880_v2 = vld [vmem:[%s2871_s22 + $0x48] sm:$0xff]  ;;  %v2894_v8 = vld [vmem:[%s2871_s22 + $0x18] sm:$0xff]  ;;  %2472 = vmatprep.subr.bf16.mxu0 %v2672_v50  ;;  %2542 = vmatprep.subr.bf16.mxu1 %v2672_v50  ;;  %s3228_s30 = sshll.u32 %s2865_s18, 2  ;;  %s2781_s18 = smov 96  }
  0x16   : > { %v2877_v1 = vld [vmem:[%s2871_s22] sm:$0xff]  ;;  %v488_v3 = vmul.f32 %v2874_v0, %v2874_v0  ;;  %v489_v5 = vmul.f32 %v2880_v2, %v2880_v2  ;;  %v2889_v6 = vld [vmem:[%s2871_s22 + $0x8] sm:$0xff]  ;;  %v2897_v9 = vld [vmem:[%s2871_s22 + $0x10] sm:$0xff]  ;;  %v483_v15 = vmul.f32 %v2894_v8, %v2894_v8  ;;  %s3236_s19 = scalar_lea.vmem %s4015_s9, %s3228_s30  ;;  %s3793_s20 = scalar_lea.vmem %s4013_s7, %s3228_s30 }
  0x17   : > { %v480_v4 = vmul.f32 %v2877_v1, %v2877_v1  ;;  %v481_v7 = vmul.f32 %v2889_v6, %v2889_v6  ;;  %v2902_v12 = vld [vmem:[%s2871_s22 + $0x58] sm:$0xff]  ;;  %v482_v16 = vmul.f32 %v2897_v9, %v2897_v9  ;;  %v2911_v17 = vld [vmem:[%s2871_s22 + $0x50] sm:$0xff]  ;;  %v2920_v22 = vld [vmem:[%s2871_s22 + $0x28] sm:$0xff]  ;;  %s3815_s23 = scalar_lea.vmem %s4014_s8, %s3228_s30 }
  0x18   : > { %v521_v10 = vsel %vm496_vm0, %v488_v3, 0.0  ;;  %v524_v13 = vsel %vm496_vm0, %v489_v5, 0.0  ;;  %v506_v18 = vsel %vm496_vm0, %v483_v15, 0.0  ;;  %v491_v20 = vmul.f32 %v2902_v12, %v2902_v12  ;;  %v2923_v23 = vld [vmem:[%s2871_s22 + $0x20] sm:$0xff]  ;;  %v2932_v28 = vld [vmem:[%s2871_s22 + $0x68] sm:$0xff]  ;;  %v2944_v34 = vld [vmem:[%s2871_s22 + $0x38] sm:$0xff]  ;;  %2473 = vmatpush3.bf16.msra.mxu0 %v2672_v50  ;;  %2546 = vmatpush3.bf16.msra.mxu1 %v2672_v50 }
  0x19   : > { %v497_v11 = vsel %vm496_vm0, %v480_v4, 0.0  ;;  %522 = vadd.xlane.f32.xlu1 %v521_v10  ;;  %v500_v14 = vsel %vm496_vm0, %v481_v7, 0.0  ;;  %v503_v19 = vsel %vm496_vm0, %v482_v16, 0.0  ;;  %v490_v21 = vmul.f32 %v2911_v17, %v2911_v17  ;;  %v2935_v29 = vld [vmem:[%s2871_s22 + $0x60] sm:$0xff]  ;;  %v2947_v35 = vld [vmem:[%s2871_s22 + $0x30] sm:$0xff]  ;;  %v2956_v40 = vld [vmem:[%s2871_s22 + $0x78] sm:$0xff]  ;;  %2474 = vmatprep.subr.bf16.mxu0 %v2673_v51 }
  0x1a   : > { %498 = vadd.xlane.f32.xlu0 %v497_v11  ;;  %v530_v24 = vsel %vm496_vm0, %v491_v20, 0.0  ;;  %v485_v26 = vmul.f32 %v2920_v22, %v2920_v22  ;;  %v484_v27 = vmul.f32 %v2923_v23, %v2923_v23  ;;  %v493_v32 = vmul.f32 %v2932_v28, %v2932_v28  ;;  %v2959_v41 = vld [vmem:[%s2871_s22 + $0x70] sm:$0xff]  ;;  %2543 = vmatprep.subr.bf16.mxu1 %v2673_v51  ;;  %v895_v57 = vld [vmem:[%s2999_s24 + $0x20] sm:$0xff]  ;;  %v3019_v58 = vld [vmem:[%s2999_s24 + $0x18] sm:$0xff] }
  0x1b   : > { %v527_v25 = vsel %vm496_vm0, %v490_v21, 0.0  ;;  %v492_v33 = vmul.f32 %v2935_v29, %v2935_v29  ;;  %v487_v38 = vmul.f32 %v2944_v34, %v2944_v34  ;;  %v486_v39 = vmul.f32 %v2947_v35, %v2947_v35  ;;  %v897_v59 = vld [vmem:[%s2999_s24 + $0x30] sm:$0xff]  ;;  %v896_v60 = vld [vmem:[%s2999_s24 + $0x28] sm:$0xff]  ;;  %v899_v61 = vld [vmem:[%s2999_s24 + $0x40] sm:$0xff] }
  0x1c   : > { %v512_v30 = vsel %vm496_vm0, %v485_v26, 0.0  ;;  %v509_v31 = vsel %vm496_vm0, %v484_v27, 0.0  ;;  %v536_v36 = vsel %vm496_vm0, %v493_v32, 0.0  ;;  %v495_v44 = vmul.f32 %v2956_v40, %v2956_v40  ;;  %2475 = vmatpush3.bf16.msra.mxu0 %v2673_v51  ;;  %2547 = vmatpush3.bf16.msra.mxu1 %v2673_v51  ;;  %v898_v62 = vld [vmem:[%s2999_s24 + $0x38] sm:$0xff]  ;;  %v901_v63 = vld [vmem:[%s2999_s24 + $0x50] sm:$0xff]  ;;  %v900_v3 = vld [vmem:[%s2999_s24 + $0x48] sm:$0xff] }
  0x1d   : > { %525 = vadd.xlane.f32.xlu1 %v524_v13  ;;  %v533_v37 = vsel %vm496_vm0, %v492_v33, 0.0  ;;  %v518_v42 = vsel %vm496_vm0, %v487_v38, 0.0  ;;  %v515_v43 = vsel %vm496_vm0, %v486_v39, 0.0  ;;  %v494_v45 = vmul.f32 %v2959_v41, %v2959_v41  ;;  %2516 = vmatprep.subr.bf16.mxu0 %v2984_v52  ;;  %v903_v4 = vld [vmem:[%s2999_s24 + $0x60] sm:$0xff]  ;;  %v902_v5 = vld [vmem:[%s2999_s24 + $0x58] sm:$0xff]  ;;  %v905_v7 = vld [vmem:[%s2999_s24 + $0x70] sm:$0xff] }
  0x1e   : > { %501 = vadd.xlane.f32.xlu0 %v500_v14  ;;  %v542_v46 = vsel %vm496_vm0, %v495_v44, 0.0  ;;  %2492 = vmatprep.subr.bf16.mxu1 %v2990_v53  ;;  %v904_v10 = vld [vmem:[%s2999_s24 + $0x68] sm:$0xff]  ;;  %v3050_v11 = vld [vmem:[%s3044_s28] sm:$0xff]  ;;  %v906_v13 = vld [vmem:[%s2999_s24 + $0x78] sm:$0xff] }
  0x1f   : > { %v539_v47 = vsel %vm496_vm0, %v494_v45, 0.0  ;;  %v3057_v14 = vld [vmem:[%s3044_s28 + $0x10] sm:$0xff]  ;;  %v3063_v15 = vld [vmem:[%s3044_s28 + $0x8] sm:$0xff]  ;;  %v3066_v16 = vld [vmem:[%s3044_s28 + $0x20] sm:$0xff] }
  0x20   : > { %v3083_v26 = vld [vmem:[%s3044_s28 + $0x28] sm:$0xff]  ;;  %v883_v27 = vld [vmem:[%s3044_s28 + $0x40] sm:$0xff]  ;;  %v3090_v38 = vld [vmem:[%s3044_s28 + $0x38] sm:$0xff] }
  0x21   : > { %507 = vadd.xlane.f32.xlu1 %v506_v18  ;;  %v3073_v18 = vld [vmem:[%s3044_s28 + $0x18] sm:$0xff]  ;;  %v3093_v39 = vld [vmem:[%s3044_s28 + $0x50] sm:$0xff]  ;;  %v884_v48 = vld [vmem:[%s3044_s28 + $0x48] sm:$0xff] }
  0x22   : > { %504 = vadd.xlane.f32.xlu0 %v503_v19  ;;  %v3076_v19 = vld [vmem:[%s3044_s28 + $0x30] sm:$0xff]  ;;  %v887_v49 = vld [vmem:[%s3044_s28 + $0x60] sm:$0xff] }
  0x25   : > { %531 = vadd.xlane.f32.xlu1 %v530_v24 }
  0x26   : > { %528 = vadd.xlane.f32.xlu0 %v527_v25 }
  0x29   : > { %513 = vadd.xlane.f32.xlu1 %v512_v30 }
  0x2a   : > { %510 = vadd.xlane.f32.xlu0 %v509_v31 }
  0x2d   : > { %537 = vadd.xlane.f32.xlu1 %v536_v36 }
  0x2e   : > { %534 = vadd.xlane.f32.xlu0 %v533_v37 }
  0x31   : > { %519 = vadd.xlane.f32.xlu1 %v518_v42 }
  0x32   : > { %516 = vadd.xlane.f32.xlu0 %v515_v43 }
  0x35   : > { %543 = vadd.xlane.f32.xlu1 %v542_v46 }
  0x36   : > { %540 = vadd.xlane.f32.xlu0 %v539_v47 }
  0x46   : > { %1070 = vrot.lane.b32.xlu1 %v3002_v54, %s2780_s25 }
  0x4a   : > { %1072 = vrot.lane.b32.xlu1 %v3012_v56, %s2780_s25 }
  0x4c   : > { %1068 = vrot.lane.b32.xlu0 %v3005_v55, %s2780_s25 }
  0x4e   : > { %1074 = vrot.lane.b32.xlu1 %v3019_v58, %s2780_s25 }
  0x50   : > { %1076 = vrot.lane.b32.xlu0 %v895_v57, %s2780_s25 }
  0x52   : > { %1078 = vrot.lane.b32.xlu1 %v896_v60, %s2780_s25 }
  0x54   : > { %1080 = vrot.lane.b32.xlu0 %v897_v59, %s2780_s25 }
  0x56   : > { %1082 = vrot.lane.b32.xlu1 %v898_v62, %s2780_s25  ;;  %v3104_v62 = vld [vmem:[%s3044_s28 + $0x58] sm:$0xff] }
  0x57   : > { %4042 = vst [vmem:[#allocation2_spill] sm:$0xff] %v3104_v62 }
  0x58   : > { %1084 = vrot.lane.b32.xlu0 %v899_v61, %s2780_s25 }
  0x5a   : > { %1086 = vrot.lane.b32.xlu1 %v900_v3, %s2780_s25 }
  0x5c   : > { %1088 = vrot.lane.b32.xlu0 %v901_v63, %s2780_s25  ;;  %v889_v63 = vld [vmem:[%s3044_s28 + $0x70] sm:$0xff] }
  0x5e   : > { %1090 = vrot.lane.b32.xlu1 %v902_v5, %s2780_s25 }
  0x60   : > { %1092 = vrot.lane.b32.xlu0 %v903_v4, %s2780_s25 }
  0x62   : > { %1094 = vrot.lane.b32.xlu1 %v904_v10, %s2780_s25 }
  0x64   : > { %1096 = vrot.lane.b32.xlu0 %v905_v7, %s2780_s25 }
  0x66   : > { %1098 = vrot.lane.b32.xlu1 %v906_v13, %s2780_s25 }
  0x68   : > { %1244 = vrot.lane.b32.xlu0 %v3050_v11, %s2780_s25 }
  0x6a   : > { %1246 = vrot.lane.b32.xlu1 %v3063_v15, %s2780_s25 }
  0x6c   : > { %1248 = vrot.lane.b32.xlu0 %v3057_v14, %s2780_s25 }
  0x6e   : > { %1250 = vrot.lane.b32.xlu1 %v3073_v18, %s2780_s25 }
  0x70   : > { %1252 = vrot.lane.b32.xlu0 %v3066_v16, %s2780_s25 }
  0x72   : > { %1254 = vrot.lane.b32.xlu1 %v3083_v26, %s2780_s25 }
  0x74   : > { %1256 = vrot.lane.b32.xlu0 %v3076_v19, %s2780_s25 }
  0x76   : > { %1258 = vrot.lane.b32.xlu1 %v3090_v38, %s2780_s25 }
  0x78   : > { %1260 = vrot.lane.b32.xlu0 %v883_v27, %s2780_s25 }
  0x7a   : > { %1262 = vrot.lane.b32.xlu1 %v884_v48, %s2780_s25 }
  0x7c   : > { %1264 = vrot.lane.b32.xlu0 %v3093_v39, %s2780_s25 }
  0x7e   : > { %1266 = vrot.lane.b32.xlu1 %v3104_v62, %s2780_s25 }
  0x80   : > { %1268 = vrot.lane.b32.xlu0 %v887_v49, %s2780_s25 }
  0x84   : > { %1272 = vrot.lane.b32.xlu0 %v889_v63, %s2780_s25 }
  0xa2   : > { %v523_v20 = vpop.xlane.xlu1 %522 }
  0xa3   : > { %v499_v21 = vpop.xlane.xlu0 %498  ;;  %v554_v24 = vmul.f32 0.015625, %v523_v20 }
  0xa4   : > { %v546_v25 = vmul.f32 0.015625, %v499_v21  ;;  %v888_v21 = vld [vmem:[%s3044_s28 + $0x68] sm:$0xff] }
  0xa5   : > { %v570_v30 = vadd.f32 1e-05, %v554_v24  ;;  %1270 = vrot.lane.b32.xlu1 %v888_v21, %s2780_s25 }
  0xa6   : > { %v562_v31 = vadd.f32 1e-05, %v546_v25  ;;  %v526_v32 = vpop.xlane.xlu1 %525 }
  0xa7   : > { %v502_v33 = vpop.xlane.xlu0 %501  ;;  %2682 = vrsqrt.f32 %v570_v30  ;;  %v555_v36 = vmul.f32 0.015625, %v526_v32 }
  0xa8   : > { %v547_v37 = vmul.f32 0.015625, %v502_v33  ;;  %2684 = vrsqrt.f32 %v562_v31 }
  0xa9   : > { %v571_v42 = vadd.f32 1e-05, %v555_v36 }
  0xaa   : > { %v563_v43 = vadd.f32 1e-05, %v547_v37  ;;  %v508_v44 = vpop.xlane.xlu1 %507  ;;  %v3115_v37 = vld [vmem:[%s4007_s1] ss:$0 sm:$0xff] }
  0xab   : > { %v505_v45 = vpop.xlane.xlu0 %504  ;;  %2686 = vrsqrt.f32 %v571_v42  ;;  %v549_v46 = vmul.f32 0.015625, %v508_v44  ;;  %v3120_v44 = vld [vmem:[%s3044_s28 + $0x78] sm:$0xff] }
  0xac   : > { %v548_v47 = vmul.f32 0.015625, %v505_v45  ;;  %2688 = vrsqrt.f32 %v563_v43  ;;  %4043 = vst [vmem:[#allocation3_spill] sm:$0xff] %v3120_v44  ;;  %1274 = vrot.lane.b32.xlu1 %v3120_v44, %s2780_s25 }
  0xad   : > { %v565_v50 = vadd.f32 1e-05, %v549_v46 }
  0xae   : > { %v564_v51 = vadd.f32 1e-05, %v548_v47  ;;  %v532_v57 = vpop.xlane.xlu1 %531 }
  0xaf   : > { %v529_v59 = vpop.xlane.xlu0 %528  ;;  %2690 = vrsqrt.f32 %v565_v50  ;;  %v557_v60 = vmul.f32 0.015625, %v532_v57 }
  0xb0   : > { %v556_v61 = vmul.f32 0.015625, %v529_v59  ;;  %2692 = vrsqrt.f32 %v564_v51 }
  0xb1   : > { %v573_v3 = vadd.f32 1e-05, %v557_v60 }
  0xb2   : > { %v572_v4 = vadd.f32 1e-05, %v556_v61  ;;  %v514_v5 = vpop.xlane.xlu1 %513 }
  0xb3   : > { %v511_v7 = vpop.xlane.xlu0 %510  ;;  %2694 = vrsqrt.f32 %v573_v3  ;;  %v551_v10 = vmul.f32 0.015625, %v514_v5 }
  0xb4   : > { %v550_v13 = vmul.f32 0.015625, %v511_v7  ;;  %v2683_v20 = vpop.eup %2682  ;;  %2696 = vrsqrt.f32 %v572_v4 }
  0xb5   : > { %v2685_v24 = vpop.eup %2684  ;;  %v567_v25 = vadd.f32 1e-05, %v551_v10  ;;  %v602_v32 = vmul.f32 %v2683_v20, %v2874_v0 }
  0xb6   : > { %v566_v27 = vadd.f32 1e-05, %v550_v13  ;;  %v538_v30 = vpop.xlane.xlu1 %537  ;;  %v594_v43 = vmul.f32 %v2685_v24, %v2877_v1 }
  0xb7   : > { %v535_v31 = vpop.xlane.xlu0 %534  ;;  %2698 = vrsqrt.f32 %v567_v25  ;;  %v559_v33 = vmul.f32 0.015625, %v538_v30  ;;  %v625_v51 = vmul.f32 %v3115_v37, %v602_v32 }
  0xb8   : > { %v558_v36 = vmul.f32 0.015625, %v535_v31  ;;  %v2687_v42 = vpop.eup %2686  ;;  %2700 = vrsqrt.f32 %v566_v27  ;;  %v617_v61 = vmul.f32 %v3115_v37, %v594_v43 }
  0xb9   : > { %v2689_v45 = vpop.eup %2688  ;;  %v575_v46 = vadd.f32 1e-05, %v559_v33  ;;  %v603_v0 = vmul.f32 %v2687_v42, %v2880_v2  ;;  %v2676_v42 = vld [vmem:[%s4009_s3 + $0x10] sm:$0xff]  }
  0xba   : > { %v574_v47 = vadd.f32 1e-05, %v558_v36  ;;  %v520_v48 = vpop.xlane.xlu1 %519  ;;  %v595_v50 = vmul.f32 %v2689_v45, %v2889_v6 }
  0xbb   : > { %v517_v49 = vpop.xlane.xlu0 %516  ;;  %2702 = vrsqrt.f32 %v575_v46  ;;  %v553_v57 = vmul.f32 0.015625, %v520_v48  ;;  %v626_v60 = vmul.f32 %v3115_v37, %v603_v0  ;;  %v2677_v48 = vld [vmem:[%s4008_s2 + $0x10] sm:$0xff]  }
  0xbc   : > { %v552_v59 = vmul.f32 0.015625, %v517_v49  ;;  %v2691_v1 = vpop.eup %2690  ;;  %2704 = vrsqrt.f32 %v574_v47  ;;  %v618_v2 = vmul.f32 %v3115_v37, %v595_v50  ;;  %v2678_v49 = vld [vmem:[%s4009_s3 + $0x8] sm:$0xff]  }
  0xbd   : > { %v2693_v63 = vpop.eup %2692  ;;  %v569_v3 = vadd.f32 1e-05, %v553_v57  ;;  %v3130_v6 = vpack.c.bf16 %v626_v60, %v625_v51  ;;  %v597_v5 = vmul.f32 %v2691_v1, %v2894_v8  ;;  %v2679_v60 = vld [vmem:[%s4008_s2 + $0x8] sm:$0xff]   ;;  %v2680_v1 = vld [vmem:[%s4009_s3] sm:$0xff]  }
  0xbe   : > { %v568_v4 = vadd.f32 1e-05, %v552_v59  ;;  %v544_v7 = vpop.xlane.xlu1 %543  ;;  %v3133_v13 = vpack.c.bf16 %v618_v2, %v617_v61  ;;  %v596_v20 = vmul.f32 %v2693_v63, %v2897_v9 }
  0xbf   : > { %v541_v10 = vpop.xlane.xlu0 %540  ;;  %2706 = vrsqrt.f32 %v569_v3  ;;  %v561_v21 = vmul.f32 0.015625, %v544_v7  ;;  %2484 = vmatprep.mubr.msk.bf16.mxu1 %vm496_vm0, %v3130_v6  ;;  %v620_v25 = vmul.f32 %v3115_v37, %v597_v5 }
  0xc0   : > { %v560_v24 = vmul.f32 0.015625, %v541_v10  ;;  %v2695_v27 = vpop.eup %2694  ;;  %2708 = vrsqrt.f32 %v568_v4  ;;  %2476 = vmatprep.mubr.msk.bf16.mxu0 %vm496_vm0, %v3133_v13  ;;  %v619_v8 = vmul.f32 %v3115_v37, %v596_v20  ;;  %v2681_v4 = vld [vmem:[%s4008_s2] sm:$0xff]  }
  0xc1   : > { %v2697_v30 = vpop.eup %2696  ;;  %v577_v31 = vadd.f32 1e-05, %v561_v21  ;;  %v605_v9 = vmul.f32 %v2695_v27, %v2902_v12 }
  0xc2   : > { %v576_v32 = vadd.f32 1e-05, %v560_v24  ;;  %v3143_v33 = vpack.c.bf16 %v620_v25, %v619_v8  ;;  %v604_v36 = vmul.f32 %v2697_v30, %v2911_v17 }
  0xc3   : > { %2710 = vrsqrt.f32 %v577_v31  ;;  %v628_v43 = vmul.f32 %v3115_v37, %v605_v9 }
  0xc4   : > { %v2699_v45 = vpop.eup %2698  ;;  %2712 = vrsqrt.f32 %v576_v32  ;;  %2477 = vmatmul.mubr.msk.bf16.vlgmr.msra.gmra.mxu0 %vm496_vm0, %v3143_v33  ;;  %v627_v46 = vmul.f32 %v3115_v37, %v604_v36 }
  0xc5   : > { %v2701_v47 = vpop.eup %2700  ;;  %v599_v12 = vmul.f32 %v2699_v45, %v2920_v22  ;;  %2517 = vmatpush3.bf16.msra.mxu0 %v2984_v52 }
  0xc6   : > { %v638_v17 = vpack.c.bf16 %v628_v43, %v627_v46  ;;  %v598_v0 = vmul.f32 %v2701_v47, %v2923_v23  ;;  %2518 = vmatprep.subr.bf16.mxu0 %v2676_v42 }
  0xc7   : > { %v622_v50 = vmul.f32 %v3115_v37, %v599_v12 }
  0xc8   : > { %v2703_v51 = vpop.eup %2702  ;;  %2485 = vmatmul.mubr.msk.bf16.vlgmr.msra.gmra.mxu1 %vm496_vm0, %v638_v17  ;;  %v621_v22 = vmul.f32 %v3115_v37, %v598_v0 }
  0xc9   : > { %v2705_v52 = vpop.eup %2704  ;;  %v607_v57 = vmul.f32 %v2703_v51, %v2932_v28  ;;  %2493 = vmatpush3.bf16.msra.mxu1 %v2990_v53  ;;  %2519 = vmatpush3.bf16.msra.mxu0 %v2676_v42 }
  0xca   : > { %v635_v23 = vpack.c.bf16 %v622_v50, %v621_v22  ;;  %v606_v59 = vmul.f32 %v2705_v52, %v2935_v29  ;;  %2494 = vmatprep.subr.bf16.mxu1 %v2677_v48  ;;  %2520 = vmatprep.subr.bf16.mxu0 %v2678_v49 }
  0xcb   : > { %v630_v61 = vmul.f32 %v3115_v37, %v607_v57 }
  0xcc   : > { %v2707_v2 = vpop.eup %2706  ;;  %2480 = vmatprep.mubr.msk.bf16.mxu0 %vm496_vm0, %v635_v23  ;;  %v629_v28 = vmul.f32 %v3115_v37, %v606_v59 }
  0xcd   : > { %v2709_v53 = vpop.eup %2708  ;;  %v601_v29 = vmul.f32 %v2707_v2, %v2944_v34  ;;  %2495 = vmatpush3.bf16.msra.mxu1 %v2677_v48  ;;  %2521 = vmatpush3.bf16.msra.mxu0 %v2678_v49 }
  0xce   : > { %v639_v63 = vpack.c.bf16 %v630_v61, %v629_v28  ;;  %v600_v3 = vmul.f32 %v2709_v53, %v2947_v35  ;;  %2496 = vmatprep.subr.bf16.mxu1 %v2679_v60  ;;  %2522 = vmatprep.subr.bf16.mxu0 %v2680_v1 }
  0xcf   : > { %v624_v5 = vmul.f32 %v3115_v37, %v601_v29 }
  0xd0   : > { %v2711_v7 = vpop.eup %2710  ;;  %2488 = vmatprep.mubr.msk.bf16.mxu1 %vm496_vm0, %v639_v63  ;;  %v623_v10 = vmul.f32 %v3115_v37, %v600_v3 }
  0xd1   : > { %v2713_v20 = vpop.eup %2712  ;;  %v609_v34 = vmul.f32 %v2711_v7, %v2956_v40  ;;  %2497 = vmatpush3.bf16.msra.mxu1 %v2679_v60  ;;  %2523 = vmatpush3.bf16.msra.mxu0 %v2680_v1  ;;  %v3213_v40 = vpop.permute.xlu1 %1070 }
  0xd2   : > { %v636_v21 = vpack.c.bf16 %v624_v5, %v623_v10  ;;  %v608_v35 = vmul.f32 %v2713_v20, %v2959_v41  ;;  %2498 = vmatprep.subr.bf16.mxu1 %v2681_v4 }
  0xd3   : > { %v632_v24 = vmul.f32 %v3115_v37, %v609_v34 }
  0xd4   : > { %2481 = vmatmul.mubr.msk.bf16.gmra.mxu0 %vm496_vm0, %v636_v21  ;;  %v631_v25 = vmul.f32 %v3115_v37, %v608_v35  ;;  %v3217_v37 = vpop.permute.xlu0 %1068 }
  0xd5   : > { %2524 = vmatprep.mubr.msk.bf16.mxu0 %vm496_vm0, %v3133_v13  ;;  %2499 = vmatpush3.bf16.msra.mxu1 %v2681_v4  ;;  %v3215_v41 = vpop.permute.xlu1 %1072 }
  0xd6   : > { %v640_v27 = vpack.c.bf16 %v632_v24, %v631_v25 }
  0xd8   : > { %2489 = vmatmul.mubr.msk.bf16.gmra.mxu1 %vm496_vm0, %v640_v27 }
  0xd9   : > { %2500 = vmatprep.mubr.msk.bf16.mxu1 %vm496_vm0, %v3133_v13  ;;  %v3219_v13 = vpop.permute.xlu1 %1074 }
  0xdc   : > { %2525 = vmatmul.mubr.msk.bf16.vlgmr.msra.gmra.mxu0 %vm496_vm0, %v3143_v33 }
  0xdd   : > { %2528 = vmatprep.mubr.msk.bf16.mxu0 %vm496_vm0, %v635_v23  ;;  %v3223_v8 = vpop.permute.xlu1 %1078 }
  0xe0   : > { %2501 = vmatmul.mubr.msk.bf16.vlgmr.msra.gmra.mxu1 %vm496_vm0, %v3143_v33 }
  0xe1   : > { %2504 = vmatprep.mubr.msk.bf16.mxu1 %vm496_vm0, %v635_v23  ;;  %v3230_v31 = vpop.permute.xlu1 %1082 }
  0xe4   : > { %2529 = vmatmul.mubr.msk.bf16.gmra.mxu0 %vm496_vm0, %v636_v21 }
  0xe5   : > { %2532 = vmatprep.mubr.msk.bf16.mxu0 %vm496_vm0, %v3130_v6  ;;  %v3244_v12 = vpop.permute.xlu1 %1086 }
  0xe8   : > { %2505 = vmatmul.mubr.msk.bf16.gmra.mxu1 %vm496_vm0, %v636_v21 }
  0xe9   : > { %2508 = vmatprep.mubr.msk.bf16.mxu1 %vm496_vm0, %v3130_v6  ;;  %v3221_v6 = vpop.permute.xlu0 %1076  ;;  %v3258_v23 = vpop.permute.xlu1 %1090 }
  0xec   : > { %2533 = vmatmul.mubr.msk.bf16.gmra.mxu0 %vm496_vm0, %v638_v17 }
  0xed   : > { %2536 = vmatprep.mubr.msk.bf16.mxu0 %vm496_vm0, %v639_v63  ;;  %v3225_v30 = vpop.permute.xlu0 %1080  ;;  %v3264_v1 = vpop.permute.xlu1 %1094 }
  0xf0   : > { %2509 = vmatmul.mubr.msk.bf16.gmra.mxu1 %vm496_vm0, %v638_v17 }
  0xf1   : > { %2512 = vmatprep.mubr.msk.bf16.mxu1 %vm496_vm0, %v639_v63  ;;  %v3238_v33 = vpop.permute.xlu0 %1084  ;;  %v3272_v10 = vpop.permute.xlu1 %1098 }
  0xf4   : > { %2537 = vmatmul.mubr.msk.bf16.gmra.mxu0 %vm496_vm0, %v640_v27 }
  0xf5   : > { %v3250_v50 = vpop.permute.xlu0 %1088 }
  0xf8   : > { %2513 = vmatmul.mubr.msk.bf16.gmra.mxu1 %vm496_vm0, %v640_v27 }
  0xf9   : > { %v3262_v59 = vpop.permute.xlu0 %1092 }
  0xfd   : > { %v3268_v28 = vpop.permute.xlu0 %1096 }
 0x101   : > { %v1245_v24 = vpop.permute.xlu0 %1244 }
 0x184   : > { %v2478_v32 = vpop.f32.mrf.mxu0 }
 0x185   : > { %v2386_v9 = vpack.c.bf16 %v2478_v32, %v2478_v32 }
 0x186   : > { %v731_v36 = vpop.f32.mrf.mxu0 }
 0x187   : > { %861 = vst.msk [vmem:[%s3236_s19 + $0x8] sm:$0xf] %vm858_vm1, %v2386_v9  ;;  %v2384_v42 = vpack.c.bf16 %v731_v36, %v731_v36  ;;  %v1247_v9 = vpop.permute.xlu1 %1246 }
 0x188   : > { %v2479_v43 = vpop.f32.mrf.mxu0  ;;  %v2486_v45 = vpop.f32.mrf.mxu1 }
 0x189   : > { %859 = vst.msk [vmem:[%s3236_s19] sm:$0xf] %vm858_vm1, %v2384_v42  ;;  %v2387_v46 = vpack.c.bf16 %v2479_v43, %v2479_v43  ;;  %v2394_v47 = vpack.c.bf16 %v2486_v45, %v2486_v45  ;;  %v1249_v45 = vpop.permute.xlu0 %1248 }
 0x18a   : > { %v734_v17 = vpop.f32.mrf.mxu0  ;;  %v763_v0 = vpop.f32.mrf.mxu1 }
 0x18b   : > { %862 = vst.msk [vmem:[%s3236_s19 + $0xc] sm:$0xf] %vm858_vm1, %v2387_v46  ;;  %869 = vst.msk [vmem:[%s3236_s19 + $0x28] sm:$0xf] %vm858_vm1, %v2394_v47  ;;  %v2385_v48 = vpack.c.bf16 %v734_v17, %v734_v17  ;;  %v2392_v49 = vpack.c.bf16 %v763_v0, %v763_v0 }
 0x18c   : > { %v2487_v51 = vpop.f32.mrf.mxu1 }
 0x18d   : > { %860 = vst.msk [vmem:[%s3236_s19 + $0x4] sm:$0xf] %vm858_vm1, %v2385_v48  ;;  %867 = vst.msk [vmem:[%s3236_s19 + $0x20] sm:$0xf] %vm858_vm1, %v2392_v49  ;;  %v2395_v22 = vpack.c.bf16 %v2487_v51, %v2487_v51  ;;  %v1251_v48 = vpop.permute.xlu1 %1250 }
 0x18e   : > { %v766_v52 = vpop.f32.mrf.mxu1 }
 0x18f   : > { %870 = vst.msk [vmem:[%s3236_s19 + $0x2c] sm:$0xf] %vm858_vm1, %v2395_v22  ;;  %v2393_v57 = vpack.c.bf16 %v766_v52, %v766_v52 }
 0x191   : > { %868 = vst.msk [vmem:[%s3236_s19 + $0x24] sm:$0xf] %vm858_vm1, %v2393_v57 }
 0x194   : > { %v2482_v60 = vpop.f32.mrf.mxu0 }
 0x195   : > { %v2390_v61 = vpack.c.bf16 %v2482_v60, %v2482_v60 }
 0x196   : > { %v747_v2 = vpop.f32.mrf.mxu0 }
 0x197   : > { %865 = vst.msk [vmem:[%s3236_s19 + $0x18] sm:$0xf] %vm858_vm1, %v2390_v61  ;;  %v2388_v53 = vpack.c.bf16 %v747_v2, %v747_v2 }
 0x198   : > { %v2483_v29 = vpop.f32.mrf.mxu0  ;;  %v2490_v63 = vpop.f32.mrf.mxu1 }
 0x199   : > { %863 = vst.msk [vmem:[%s3236_s19 + $0x10] sm:$0xf] %vm858_vm1, %v2388_v53  ;;  %v2391_v3 = vpack.c.bf16 %v2483_v29, %v2483_v29  ;;  %v2398_v4 = vpack.c.bf16 %v2490_v63, %v2490_v63 }
 0x19a   : > { %v750_v5 = vpop.f32.mrf.mxu0  ;;  %v779_v7 = vpop.f32.mrf.mxu1 }
 0x19b   : > { %866 = vst.msk [vmem:[%s3236_s19 + $0x1c] sm:$0xf] %vm858_vm1, %v2391_v3  ;;  %873 = vst.msk [vmem:[%s3236_s19 + $0x38] sm:$0xf] %vm858_vm1, %v2398_v4  ;;  %v2389_v20 = vpack.c.bf16 %v750_v5, %v750_v5  ;;  %v2396_v34 = vpack.c.bf16 %v779_v7, %v779_v7  ;;  %v1253_v7 = vpop.permute.xlu0 %1252 }
 0x19c   : > { %v2491_v21 = vpop.f32.mrf.mxu1  ;;  %v3290_v42 = vpop.f32.mrf.mxu0 }
 0x19d   : > { %864 = vst.msk [vmem:[%s3236_s19 + $0x14] sm:$0xf] %vm858_vm1, %v2389_v20  ;;  %871 = vst.msk [vmem:[%s3236_s19 + $0x30] sm:$0xf] %vm858_vm1, %v2396_v34  ;;  %v2399_v35 = vpack.c.bf16 %v2491_v21, %v2491_v21  ;;  %v1808_v49 = vmul.f32 %v3290_v42, %v1249_v45  ;;  %v1255_v34 = vpop.permute.xlu1 %1254 }
 0x19e   : > { %v782_v25 = vpop.f32.mrf.mxu1  ;;  %v3300_v0 = vpop.f32.mrf.mxu0 }
 0x19f   : > { %874 = vst.msk [vmem:[%s3236_s19 + $0x3c] sm:$0xf] %vm858_vm1, %v2399_v35  ;;  %v2397_v27 = vpack.c.bf16 %v782_v25, %v782_v25  ;;  %v1806_v29 = vmul.f32 %v3300_v0, %v1245_v24  ;;  %v1694_v5 = vmul.f32 %v3300_v0, %v3217_v37 }
 0x1a0   : > { %v3284_v32 = vpop.f32.mrf.mxu1  ;;  %v3306_v22 = vpop.f32.mrf.mxu0 }
 0x1a1   : > { %872 = vst.msk [vmem:[%s3236_s19 + $0x34] sm:$0xf] %vm858_vm1, %v2397_v27  ;;  %v1118_v36 = vmul.f32 %v3284_v32, %v3215_v41  ;;  %v1294_v17 = vmul.f32 %v3284_v32, %v1249_v45  ;;  %v1809_v52 = vmul.f32 %v3306_v22, %v1251_v48 }
 0x1a2   : > { %v3292_v43 = vpop.f32.mrf.mxu1  ;;  %v3324_v63 = vpop.f32.mrf.mxu0 }
 0x1a3   : > { %1152 = vrot.lane.b32.xlu0 %v1118_v36, %s2781_s18  ;;  %v1116_v57 = vmul.f32 %v3217_v37, %v3292_v43  ;;  %v1292_v2 = vmul.f32 %v1245_v24, %v3292_v43  ;;  %v1807_v4 = vmul.f32 %v3324_v63, %v1247_v9  ;;  %v1695_v21 = vmul.f32 %v3324_v63, %v3213_v40  ;;  %v1257_v37 = vpop.permute.xlu0 %1256 }
 0x1a4   : > { %v3295_v46 = vpop.f32.mrf.mxu1  ;;  %v3341_v24 = vpop.f32.mrf.mxu0 }
 0x1a5   : > { %v1119_v47 = vmul.f32 %v3295_v46, %v3219_v13  ;;  %v1295_v51 = vmul.f32 %v3295_v46, %v1251_v48  ;;  %v1812_v45 = vmul.f32 %v3341_v24, %v1257_v37 }
 0x1a6   : > { %v3313_v60 = vpop.f32.mrf.mxu1  ;;  %v3350_v36 = vpop.f32.mrf.mxu0 }
 0x1a7   : > { %1154 = vrot.lane.b32.xlu1 %v1119_v47, %s2781_s18  ;;  %1328 = vrot.lane.b32.xlu0 %v1294_v17, %s2781_s18  ;;  %v1117_v61 = vmul.f32 %v3213_v40, %v3313_v60  ;;  %v1293_v53 = vmul.f32 %v1247_v9, %v3313_v60  ;;  %v1259_v40 = vpop.permute.xlu1 %1258 }
 0x1a8   : > { %v3326_v3 = vpop.f32.mrf.mxu1  ;;  %v3356_v17 = vpop.f32.mrf.mxu0 }
 0x1a9   : > { %v1122_v35 = vmul.f32 %v3326_v3, %v3225_v30  ;;  %v1298_v9 = vmul.f32 %v3326_v3, %v1257_v37  ;;  %v1813_v48 = vmul.f32 %v3356_v17, %v1259_v40 }
 0x1aa   : > { %v3333_v20 = vpop.f32.mrf.mxu1 }
 0x1ab   : > { %1330 = vrot.lane.b32.xlu1 %v1295_v51, %s2781_s18  ;;  %1842 = vrot.lane.b32.xlu0 %v1808_v49, %s2781_s18  ;;  %v1120_v49 = vmul.f32 %v3221_v6, %v3333_v20 }
 0x1ac   : > { %v3343_v25 = vpop.f32.mrf.mxu1 }
 0x1ad   : > { %v1123_v27 = vmul.f32 %v3343_v25, %v3230_v31  ;;  %v1299_v47 = vmul.f32 %v3343_v25, %v1259_v40 }
 0x1ae   : > { %v3363_v51 = vpop.f32.mrf.mxu1 }
 0x1af   : > { %1844 = vrot.lane.b32.xlu1 %v1809_v52, %s2781_s18  ;;  %1148 = vrot.lane.b32.xlu0 %v1116_v57, %s2781_s18  ;;  %v1121_v52 = vmul.f32 %v3223_v8, %v3363_v51  ;;  %v1296_v57 = vmul.f32 %v1253_v7, %v3333_v20 }
 0x1b3   : > { %1150 = vrot.lane.b32.xlu1 %v1117_v61, %s2781_s18  ;;  %1324 = vrot.lane.b32.xlu0 %v1292_v2, %s2781_s18  ;;  %v3370_v61 = vpop.f32.mrf.mxu1  ;;  %v1261_v2 = vpop.permute.xlu0 %1260 }
 0x1b4   : > { %v1126_v37 = vmul.f32 %v3370_v61, %v3250_v50 }
 0x1b7   : > { %1326 = vrot.lane.b32.xlu1 %v1293_v53, %s2781_s18  ;;  %1838 = vrot.lane.b32.xlu0 %v1806_v29, %s2781_s18  ;;  %v1297_v53 = vmul.f32 %v1255_v34, %v3363_v51  ;;  %v1810_v29 = vmul.f32 %v3350_v36, %v1253_v7  ;;  %v1265_v7 = vpop.permute.xlu0 %1264 }
 0x1bb   : > { %1840 = vrot.lane.b32.xlu1 %v1807_v4, %s2781_s18  ;;  %1726 = vrot.lane.b32.xlu0 %v1694_v5, %s2781_s18  ;;  %v3376_v4 = vpop.f32.mrf.mxu0  ;;  %v3378_v5 = vpop.f32.mrf.mxu1 }
 0x1bc   : > { %4044 = vst [vmem:[#allocation4_spill] sm:$0xff] %v3378_v5 }
 0x1bf   : > { %1728 = vrot.lane.b32.xlu1 %v1695_v21, %s2781_s18  ;;  %1160 = vrot.lane.b32.xlu0 %v1122_v35, %s2781_s18  ;;  %v1263_v21 = vpop.permute.xlu1 %1262  ;;  %v1811_v35 = vmul.f32 %v3376_v4, %v1255_v34 }
 0x1c3   : > { %1162 = vrot.lane.b32.xlu1 %v1123_v27, %s2781_s18  ;;  %1336 = vrot.lane.b32.xlu0 %v1298_v9, %s2781_s18  ;;  %v3385_v27 = vpop.f32.mrf.mxu0  ;;  %v3387_v9 = vpop.f32.mrf.mxu1 }
 0x1c4   : > { %4045 = vst [vmem:[#allocation5_spill] sm:$0xff] %v3387_v9  ;;  %v1127_v40 = vmul.f32 %v3387_v9, %v3258_v23  ;;  %v1267_v34 = vpop.permute.xlu1 %1266 }
 0x1c7   : > { %1338 = vrot.lane.b32.xlu1 %v1299_v47, %s2781_s18  ;;  %1850 = vrot.lane.b32.xlu0 %v1812_v45, %s2781_s18  ;;  %v1302_v45 = vmul.f32 %v3370_v61, %v1265_v7  ;;  %v3394_v47 = vpop.f32.mrf.mxu0 }
 0x1cb   : > { %1852 = vrot.lane.b32.xlu1 %v1813_v48, %s2781_s18  ;;  %1156 = vrot.lane.b32.xlu0 %v1120_v49, %s2781_s18  ;;  %v1816_v48 = vmul.f32 %v3385_v27, %v1265_v7  ;;  %v1303_v49 = vmul.f32 %v3387_v9, %v1267_v34 }
 0x1cf   : > { %1158 = vrot.lane.b32.xlu1 %v1121_v52, %s2781_s18  ;;  %1332 = vrot.lane.b32.xlu0 %v1296_v57, %s2781_s18  ;;  %v3400_v52 = vpop.f32.mrf.mxu0 }
 0x1d0   : > { %v1817_v57 = vmul.f32 %v3400_v52, %v1267_v34  ;;  %v1814_v34 = vmul.f32 %v3394_v47, %v1261_v2 }
 0x1d3   : > { %1334 = vrot.lane.b32.xlu1 %v1297_v53, %s2781_s18  ;;  %1846 = vrot.lane.b32.xlu0 %v1810_v29, %s2781_s18  ;;  %v1124_v53 = vmul.f32 %v3238_v33, %v3378_v5  ;;  %v3407_v29 = vpop.f32.mrf.mxu1 }
 0x1d4   : > { %4046 = vst [vmem:[#allocation6_spill] sm:$0xff] %v3407_v29 }
 0x1d5   : > { %v3414_v7 = vpop.f32.mrf.mxu1 }
 0x1d6   : > { %4047 = vst [vmem:[#allocation7_spill] sm:$0xff] %v3414_v7 }
 0x1d7   : > { %1848 = vrot.lane.b32.xlu1 %v1811_v35, %s2781_s18  ;;  %1168 = vrot.lane.b32.xlu0 %v1126_v37, %s2781_s18  ;;  %v1125_v35 = vmul.f32 %v3244_v12, %v3407_v29  ;;  %v1300_v37 = vmul.f32 %v1261_v2, %v3378_v5 }
 0x1db   : > { %1170 = vrot.lane.b32.xlu1 %v1127_v40, %s2781_s18  ;;  %1344 = vrot.lane.b32.xlu0 %v1302_v45, %s2781_s18  ;;  %v1269_v40 = vpop.permute.xlu0 %1268  ;;  %v1301_v45 = vmul.f32 %v1263_v21, %v3407_v29 }
 0x1df   : > { %1346 = vrot.lane.b32.xlu1 %v1303_v49, %s2781_s18  ;;  %1858 = vrot.lane.b32.xlu0 %v1816_v48, %s2781_s18  ;;  %v3420_v48 = vpop.f32.mrf.mxu0  ;;  %v3422_v49 = vpop.f32.mrf.mxu1 }
 0x1e0   : > { %v1273_v2 = vpop.permute.xlu0 %1272 }
 0x1e1   : > { %v3431_v44 = vpop.f32.mrf.mxu1 }
 0x1e3   : > { %1860 = vrot.lane.b32.xlu1 %v1817_v57, %s2781_s18  ;;  %1164 = vrot.lane.b32.xlu0 %v1124_v53, %s2781_s18  ;;  %v1271_v57 = vpop.permute.xlu1 %1270  ;;  %v1815_v53 = vmul.f32 %v3420_v48, %v1263_v21  ;;  %v3451_v62 = vpop.f32.mrf.mxu1 }
 0x1e7   : > { %1166 = vrot.lane.b32.xlu1 %v1125_v35, %s2781_s18  ;;  %1340 = vrot.lane.b32.xlu0 %v1300_v37, %s2781_s18  ;;  %v1130_v35 = vmul.f32 %v3414_v7, %v3268_v28  ;;  %v3429_v37 = vpop.f32.mrf.mxu0  ;;  %v1275_v21 = vpop.permute.xlu1 %1274 }
 0x1e8   : > { %v1820_v5 = vmul.f32 %v3429_v37, %v1273_v2  ;;  %v1307_v9 = vmul.f32 %v3431_v44, %v1275_v21 }
 0x1e9   : > { %v3438_v29 = vpop.f32.mrf.mxu0 }
 0x1eb   : > { %1342 = vrot.lane.b32.xlu1 %v1301_v45, %s2781_s18  ;;  %1854 = vrot.lane.b32.xlu0 %v1814_v34, %s2781_s18  ;;  %v1131_v45 = vmul.f32 %v3431_v44, %v3272_v10  ;;  %v1306_v34 = vmul.f32 %v3414_v7, %v1273_v2  ;;  %v1128_v7 = vmul.f32 %v3262_v59, %v3422_v49 }
 0x1ec   : > { %v1129_v2 = vmul.f32 %v3264_v1, %v3451_v62 }
 0x1ef   : > { %1856 = vrot.lane.b32.xlu1 %v1815_v53, %s2781_s18  ;;  %1176 = vrot.lane.b32.xlu0 %v1130_v35, %s2781_s18  ;;  %v3444_v53 = vpop.f32.mrf.mxu0 }
 0x1f0   : > { %v1821_v35 = vmul.f32 %v3444_v53, %v1275_v21  ;;  %v1696_v21 = vmul.f32 %v3290_v42, %v3215_v41  ;;  %v1699_v41 = vmul.f32 %v3376_v4, %v3223_v8  ;;  %v1704_v8 = vmul.f32 %v3385_v27, %v3250_v50 }
 0x1f1   : > { %v1706_v50 = vmul.f32 %v3438_v29, %v3262_v59  ;;  %v1709_v59 = vmul.f32 %v3444_v53, %v3272_v10 }
 0x1f3   : > { %1178 = vrot.lane.b32.xlu1 %v1131_v45, %s2781_s18  ;;  %1352 = vrot.lane.b32.xlu0 %v1306_v34, %s2781_s18  ;;  %v1304_v45 = vmul.f32 %v1269_v40, %v3422_v49  ;;  %v3462_v34 = vpop.f32.mrf.mxu0 }
 0x1f4   : > { %v1707_v10 = vmul.f32 %v3462_v34, %v3264_v1 }
 0x1f7   : > { %1354 = vrot.lane.b32.xlu1 %v1307_v9, %s2781_s18  ;;  %1866 = vrot.lane.b32.xlu0 %v1820_v5, %s2781_s18  ;;  %v1305_v5 = vmul.f32 %v1271_v57, %v3451_v62  ;;  %v1818_v9 = vmul.f32 %v3438_v29, %v1269_v40  ;;  %v1698_v40 = vmul.f32 %v3350_v36, %v3221_v6 }
 0x1f8   : > { %v1702_v6 = vmul.f32 %v3394_v47, %v3238_v33  ;;  %v3505_v33 = vmul.f32 %v3295_v46, %v3073_v18  ;;  %v1214_v18 = vmul.f32 %v3284_v32, %v3012_v56 }
 0x1fb   : > { %1868 = vrot.lane.b32.xlu1 %v1821_v35, %s2781_s18  ;;  %1172 = vrot.lane.b32.xlu0 %v1128_v7, %s2781_s18  ;;  %v1819_v7 = vmul.f32 %v3462_v34, %v1271_v57  ;;  %v1697_v35 = vmul.f32 %v3306_v22, %v3219_v13  ;;  %v1700_v57 = vmul.f32 %v3341_v24, %v3225_v30 }
 0x1fc   : > { %v1701_v13 = vmul.f32 %v3356_v17, %v3230_v31  ;;  %v3491_v30 = vmul.f32 %v3284_v32, %v3057_v14  ;;  %v1705_v14 = vmul.f32 %v3400_v52, %v3258_v23  ;;  %v1708_v23 = vmul.f32 %v3429_v37, %v3268_v28 }
 0x1fd   : > { %v1792_v32 = vmul.f32 %v3290_v42, %v3012_v56  ;;  %v3533_v28 = vmul.f32 %v3292_v43, %v3050_v11 }
 0x1ff   : > { %1174 = vrot.lane.b32.xlu1 %v1129_v2, %s2781_s18  ;;  %1348 = vrot.lane.b32.xlu0 %v1304_v45, %s2781_s18  ;;  %v1703_v2 = vmul.f32 %v3420_v48, %v3244_v12 }
 0x203   : > { %1350 = vrot.lane.b32.xlu1 %v1305_v5, %s2781_s18  ;;  %1862 = vrot.lane.b32.xlu0 %v1818_v9, %s2781_s18  ;;  %v3679_v9 = vld [vmem:[%s3044_s28 + $0x70] sm:$0xff] }
 0x207   : > { %1864 = vrot.lane.b32.xlu1 %v1819_v7, %s2781_s18  ;;  %1730 = vrot.lane.b32.xlu0 %v1696_v21, %s2781_s18  ;;  %v1215_v7 = vmul.f32 %v3295_v46, %v3019_v58  ;;  %v1793_v46 = vmul.f32 %v3306_v22, %v3019_v58  ;;  %v3544_v58 = vmul.f32 %v3313_v60, %v3063_v15 }
 0x20b   : > { %1732 = vrot.lane.b32.xlu1 %v1697_v35, %s2781_s18  ;;  %1734 = vrot.lane.b32.xlu0 %v1698_v40, %s2781_s18 }
 0x20f   : > { %1736 = vrot.lane.b32.xlu1 %v1699_v41, %s2781_s18  ;;  %1738 = vrot.lane.b32.xlu0 %v1700_v57, %s2781_s18 }
 0x213   : > { %1740 = vrot.lane.b32.xlu1 %v1701_v13, %s2781_s18  ;;  %1742 = vrot.lane.b32.xlu0 %v1702_v6, %s2781_s18 }
 0x215   : > { %v3497_v45 = vpop.permute.xlu0 %1152 }
 0x217   : > { %1744 = vrot.lane.b32.xlu1 %v1703_v2, %s2781_s18  ;;  %1746 = vrot.lane.b32.xlu0 %v1704_v8, %s2781_s18 }
 0x219   : > { %v3511_v12 = vpop.permute.xlu1 %1154  ;;  %v1329_v5 = vpop.permute.xlu0 %1328 }
 0x21a   : > { %v1374_v40 = vadd.f32 %v1329_v5, %v1214_v18  ;;  %v1212_v18 = vmul.f32 %v3292_v43, %v3005_v55 }
 0x21b   : > { %1748 = vrot.lane.b32.xlu1 %v1705_v14, %s2781_s18  ;;  %1750 = vrot.lane.b32.xlu0 %v1706_v50, %s2781_s18 }
 0x21d   : > { %v1331_v21 = vpop.permute.xlu1 %1330  ;;  %v1843_v35 = vpop.permute.xlu0 %1842 }
 0x21e   : > { %v1375_v57 = vadd.f32 %v1331_v21, %v1215_v7  ;;  %v1888_v8 = vadd.f32 %v1843_v35, %v1792_v32  ;;  %v1213_v7 = vmul.f32 %v3313_v60, %v3002_v54  ;;  %v1791_v32 = vmul.f32 %v3324_v63, %v3002_v54 }
 0x21f   : > { %1756 = vrot.lane.b32.xlu1 %v1709_v59, %s2781_s18  ;;  %1754 = vrot.lane.b32.xlu0 %v1708_v23, %s2781_s18  ;;  %v3571_v54 = vmul.f32 %v3324_v63, %v3063_v15  ;;  %v3588_v15 = vmul.f32 %v3343_v25, %v3090_v38 }
 0x220   : > { %v2590_v41 = vpack.i.bf16 %v1375_v57, %v1374_v40  ;;  %v1790_v57 = vmul.f32 %v3300_v0, %v3005_v55 }
 0x221   : > { %v1845_v13 = vpop.permute.xlu1 %1844  ;;  %v3537_v6 = vpop.permute.xlu0 %1148 }
 0x222   : > { %v1889_v2 = vadd.f32 %v1845_v13, %v1793_v46 }
 0x223   : > { %1752 = vrot.lane.b32.xlu1 %v1707_v10, %s2781_s18 }
 0x224   : > { %v2595_v56 = vpack.i.bf16 %v1889_v2, %v1888_v8 }
 0x225   : > { %v3546_v50 = vpop.permute.xlu1 %1150  ;;  %v1325_v5 = vpop.permute.xlu0 %1324 }
 0x226   : > { %v1372_v21 = vadd.f32 %v1325_v5, %v1212_v18  ;;  %v2714_v18 = vld [vmem:[%s2999_s24 + $0x30] sm:$0xff] }
 0x227   : > { %2591 = vrot.lane.b32.xlu1 %v2590_v41, %s2780_s25  ;;  %v3562_v41 = vmul.f32 %v3300_v0, %v3050_v11  ;;  %v3575_v11 = vmul.f32 %v3326_v3, %v3076_v19  ;;  %v1796_v38 = vmul.f32 %v2714_v18, %v3341_v24 }
 0x229   : > { %v1327_v23 = vpop.permute.xlu1 %1326  ;;  %v1839_v59 = vpop.permute.xlu0 %1838 }
 0x22a   : > { %v1373_v35 = vadd.f32 %v1327_v23, %v1213_v7  ;;  %v1886_v60 = vadd.f32 %v1839_v59, %v1790_v57  ;;  %v1218_v7 = vmul.f32 %v2714_v18, %v3326_v3  ;;  %v2715_v23 = vld [vmem:[%s2999_s24 + $0x38] sm:$0xff]  ;;  %v3611_v18 = vmul.f32 %v3363_v51, %v3083_v26 }
 0x22b   : > { %2596 = vrot.lane.b32.xlu1 %v2595_v56, %s2780_s25  ;;  %v1219_v59 = vmul.f32 %v2715_v23, %v3343_v25 }
 0x22c   : > { %v2600_v40 = vpack.i.bf16 %v1373_v35, %v1372_v21 }
 0x22d   : > { %v1841_v43 = vpop.permute.xlu1 %1840  ;;  %v3564_v46 = vpop.permute.xlu0 %1726 }
 0x22e   : > { %v1887_v10 = vadd.f32 %v1841_v43, %v1791_v32  ;;  %2601 = vrot.lane.b32.xlu0 %v2600_v40, %s2780_s25  ;;  %v1797_v43 = vmul.f32 %v2715_v23, %v3356_v17 }
 0x230   : > { %v2605_v55 = vpack.i.bf16 %v1887_v10, %v1886_v60  ;;  %v3602_v60 = vmul.f32 %v3333_v20, %v3066_v16 }
 0x231   : > { %v3577_v0 = vpop.permute.xlu1 %1728  ;;  %v3579_v8 = vpop.permute.xlu0 %1160 }
 0x232   : > { %2606 = vrot.lane.b32.xlu0 %v2605_v55, %s2780_s25 }
 0x235   : > { %v3590_v63 = vpop.permute.xlu1 %1162  ;;  %v1337_v19 = vpop.permute.xlu0 %1336 }
 0x236   : > { %v1378_v40 = vadd.f32 %v1337_v19, %v1218_v7 }
 0x239   : > { %v1339_v21 = vpop.permute.xlu1 %1338  ;;  %v1851_v35 = vpop.permute.xlu0 %1850 }
 0x23a   : > { %v1379_v57 = vadd.f32 %v1339_v21, %v1219_v59  ;;  %v1892_v55 = vadd.f32 %v1851_v35, %v1796_v38  ;;  %v2716_v21 = vld [vmem:[%s2999_s24 + $0x20] sm:$0xff] }
 0x23b   : > { %v1216_v35 = vmul.f32 %v2716_v21, %v3333_v20 }
 0x23c   : > { %v2610_v32 = vpack.i.bf16 %v1379_v57, %v1378_v40  ;;  %v2717_v40 = vld [vmem:[%s2999_s24 + $0x28] sm:$0xff] }
 0x23d   : > { %v1853_v10 = vpop.permute.xlu1 %1852  ;;  %v3604_v3 = vpop.permute.xlu0 %1156  ;;  %v1217_v57 = vmul.f32 %v2717_v40, %v3363_v51 }
 0x23e   : > { %v1893_v25 = vadd.f32 %v1853_v10, %v1797_v43  ;;  %2611 = vrot.lane.b32.xlu1 %v2610_v32, %s2780_s25 }
 0x240   : > { %v2615_v7 = vpack.i.bf16 %v1893_v25, %v1892_v55  ;;  %v1794_v55 = vmul.f32 %v2716_v21, %v3350_v36  ;;  %v1795_v25 = vmul.f32 %v2717_v40, %v3376_v4  ;;  %v4049_v21 = vld [vmem:[#allocation5_spill] sm:$0xff] }
 0x241   : > { %v3613_v23 = vpop.permute.xlu1 %1158  ;;  %v1333_v59 = vpop.permute.xlu0 %1332 }
 0x242   : > { %2616 = vrot.lane.b32.xlu1 %v2615_v7, %s2780_s25  ;;  %v1376_v43 = vadd.f32 %v1333_v59, %v1216_v35  ;;  %v3626_v7 = vmul.f32 %v3370_v61, %v3093_v39 }
 0x245   : > { %v1335_v32 = vpop.permute.xlu1 %1334  ;;  %v1847_v38 = vpop.permute.xlu0 %1846 }
 0x246   : > { %v1377_v10 = vadd.f32 %v1335_v32, %v1217_v57  ;;  %v1890_v16 = vadd.f32 %v1847_v38, %v1794_v55  ;;  %v4048_v57 = vld [vmem:[#allocation2_spill] sm:$0xff] }
 0x247   : > { %v3635_v32 = vmul.f32 %v4049_v21, %v4048_v57 }
 0x248   : > { %v2620_v26 = vpack.i.bf16 %v1377_v10, %v1376_v43  ;;  %v2719_v10 = vld [vmem:[%s2999_s24 + $0x58] sm:$0xff]  ;;  %v3649_v43 = vld [vmem:[%s3044_s28 + $0x40] sm:$0xff] }
 0x249   : > { %v1849_v19 = vpop.permute.xlu1 %1848  ;;  %v3628_v20 = vpop.permute.xlu0 %1168  ;;  %v1801_v56 = vmul.f32 %v2719_v10, %v3400_v52 }
 0x24a   : > { %v1891_v51 = vadd.f32 %v1849_v19, %v1795_v25  ;;  %2621 = vrot.lane.b32.xlu0 %v2620_v26, %s2780_s25  ;;  %v2718_v19 = vld [vmem:[%s2999_s24 + $0x50] sm:$0xff]  ;;  %v1223_v26 = vmul.f32 %v2719_v10, %v4049_v21  ;;  %v4053_v10 = vld [vmem:[#allocation6_spill] sm:$0xff] }
 0x24b   : > { %v1222_v38 = vmul.f32 %v2718_v19, %v3370_v61  ;;  %v1800_v59 = vmul.f32 %v2718_v19, %v3385_v27 }
 0x24c   : > { %v2625_v35 = vpack.i.bf16 %v1891_v51, %v1890_v16 }
 0x24d   : > { %v3637_v40 = vpop.permute.xlu1 %1170  ;;  %v1345_v39 = vpop.permute.xlu0 %1344 }
 0x24e   : > { %2626 = vrot.lane.b32.xlu0 %v2625_v35, %s2780_s25  ;;  %v1382_v25 = vadd.f32 %v1345_v39, %v1222_v38  ;;  %v4050_v35 = vld [vmem:[#allocation4_spill] sm:$0xff]  ;;  %v3661_v38 = vld [vmem:[%s3044_s28 + $0x48] sm:$0xff] }
 0x24f   : > { %v3653_v5 = vmul.f32 %v3649_v43, %v4050_v35 }
 0x251   : > { %v1347_v16 = vpop.permute.xlu1 %1346  ;;  %v1859_v55 = vpop.permute.xlu0 %1858  ;;  %4051 = vst [vmem:[#allocation2_spill] sm:$0xff] %v3653_v5 }
 0x252   : > { %v1383_v51 = vadd.f32 %v1347_v16, %v1223_v26  ;;  %v1896_v13 = vadd.f32 %v1859_v55, %v1800_v59  ;;  %v3665_v26 = vmul.f32 %v3661_v38, %v4053_v10  ;;  %v4055_v59 = vld [vmem:[#allocation7_spill] sm:$0xff] }
 0x254   : > { %v2630_v57 = vpack.i.bf16 %v1383_v51, %v1382_v25  ;;  %v2723_v51 = vld [vmem:[%s2999_s24 + $0x48] sm:$0xff] }
 0x255   : > { %v1861_v61 = vpop.permute.xlu1 %1860  ;;  %v3655_v21 = vpop.permute.xlu0 %1164  ;;  %v1799_v31 = vmul.f32 %v2723_v51, %v3420_v48 }
 0x256   : > { %4052 = vst [vmem:[#allocation5_spill] sm:$0xff] %v3655_v21  ;;  %v1897_v2 = vadd.f32 %v1861_v61, %v1801_v56  ;;  %2631 = vrot.lane.b32.xlu1 %v2630_v57, %s2780_s25  ;;  %v2722_v56 = vld [vmem:[%s2999_s24 + $0x40] sm:$0xff] }
 0x257   : > { %v1220_v55 = vmul.f32 %v2722_v56, %v4050_v35  ;;  %v1798_v1 = vmul.f32 %v2722_v56, %v3394_v47  ;;  %v4058_v56 = vld [vmem:[#allocation3_spill] sm:$0xff] }
 0x258   : > { %v2635_v19 = vpack.i.bf16 %v1897_v2, %v1896_v13  ;;  %v1221_v13 = vmul.f32 %v2723_v51, %v4053_v10 }
 0x259   : > { %v3667_v16 = vpop.permute.xlu1 %1166  ;;  %v1341_v25 = vpop.permute.xlu0 %1340 }
 0x25a   : > { %4054 = vst [vmem:[#allocation4_spill] sm:$0xff] %v3667_v16  ;;  %2636 = vrot.lane.b32.xlu1 %v2635_v19, %s2780_s25  ;;  %v1380_v61 = vadd.f32 %v1341_v25, %v1220_v55  ;;  %v3683_v19 = vmul.f32 %v3679_v9, %v4055_v59  ;;  %v3692_v55 = vmul.f32 %v3431_v44, %v4058_v56 }
 0x25c   : > { %4056 = vst [vmem:[#allocation6_spill] sm:$0xff] %v3683_v19  ;;  %4059 = vst [vmem:[#allocation3_spill] sm:$0xff] %v3692_v55 }
 0x25d   : > { %v1343_v2 = vpop.permute.xlu1 %1342  ;;  %v1855_v57 = vpop.permute.xlu0 %1854 }
 0x25e   : > { %v1381_v39 = vadd.f32 %v1343_v2, %v1221_v13  ;;  %v1894_v10 = vadd.f32 %v1855_v57, %v1798_v1  ;;  %v2726_v57 = vld [vmem:[%s2999_s24 + $0x78] sm:$0xff]  ;;  %v2727_v2 = vld [vmem:[%s3044_s28 + $0x60] sm:$0xff] }
 0x260   : > { %v2640_v14 = vpack.i.bf16 %v1381_v39, %v1380_v61 }
 0x261   : > { %v1857_v35 = vpop.permute.xlu1 %1856  ;;  %v3685_v21 = vpop.permute.xlu0 %1176 }
 0x262   : > { %4057 = vst [vmem:[#allocation7_spill] sm:$0xff] %v3685_v21  ;;  %v1895_v5 = vadd.f32 %v1857_v35, %v1799_v31  ;;  %2641 = vrot.lane.b32.xlu0 %v2640_v14, %s2780_s25  ;;  %v2725_v31 = vld [vmem:[%s2999_s24 + $0x70] sm:$0xff]  ;;  %v1227_v14 = vmul.f32 %v2726_v57, %v3431_v44  ;;  %v1805_v21 = vmul.f32 %v2726_v57, %v3444_v53 }
 0x263   : > { %v1226_v1 = vmul.f32 %v2725_v31, %v4055_v59  ;;  %v1804_v39 = vmul.f32 %v2725_v31, %v3429_v37  ;;  %v2728_v31 = vld [vmem:[%s3044_s28 + $0x68] sm:$0xff] }
 0x264   : > { %v2645_v25 = vpack.i.bf16 %v1895_v5, %v1894_v10  ;;  %v3716_v57 = vmul.f32 %v2728_v31, %v3451_v62 }
 0x265   : > { %v3694_v51 = vpop.permute.xlu1 %1178  ;;  %v1353_v13 = vpop.permute.xlu0 %1352 }
 0x266   : > { %4060 = vst [vmem:[#allocation8_spill] sm:$0xff] %v3694_v51  ;;  %2646 = vrot.lane.b32.xlu0 %v2645_v25, %s2780_s25  ;;  %v1386_v35 = vadd.f32 %v1353_v13, %v1226_v1  ;;  %v3707_v25 = vmul.f32 %v2727_v2, %v3422_v49  ;;  %4063 = vst [vmem:[#allocation11_spill] sm:$0xff] %v3716_v57 }
 0x268   : > { %4061 = vst [vmem:[#allocation9_spill] sm:$0xff] %v3707_v25 }
 0x269   : > { %v1355_v5 = vpop.permute.xlu1 %1354  ;;  %v1867_v61 = vpop.permute.xlu0 %1866 }
 0x26a   : > { %v1387_v10 = vadd.f32 %v1355_v5, %v1227_v14  ;;  %v1900_v44 = vadd.f32 %v1867_v61, %v1804_v39  ;;  %v2729_v39 = vld [vmem:[%s2999_s24 + $0x60] sm:$0xff]  ;;  %v2730_v61 = vld [vmem:[%s2999_s24 + $0x68] sm:$0xff] }
 0x26b   : > { %v1803_v25 = vmul.f32 %v2730_v61, %v3462_v34 }
 0x26c   : > { %v2650_v56 = vpack.i.bf16 %v1387_v10, %v1386_v35  ;;  %v1225_v10 = vmul.f32 %v2730_v61, %v3451_v62 }
 0x26d   : > { %v1869_v59 = vpop.permute.xlu1 %1868  ;;  %v3709_v19 = vpop.permute.xlu0 %1172 }
 0x26e   : > { %4062 = vst [vmem:[#allocation10_spill] sm:$0xff] %v3709_v19  ;;  %v1901_v51 = vadd.f32 %v1869_v59, %v1805_v21  ;;  %2651 = vrot.lane.b32.xlu1 %v2650_v56, %s2780_s25  ;;  %v1224_v21 = vmul.f32 %v2729_v39, %v3422_v49  ;;  %v1802_v19 = vmul.f32 %v2729_v39, %v3438_v29 }
 0x26f   : > { %v3739_v39 = vmul.f32 %v3649_v43, %v3394_v47  ;;  %v3758_v47 = vmul.f32 %v2727_v2, %v3438_v29 }
 0x270   : > { %v2665_v1 = vpack.i.bf16 %v1901_v51, %v1900_v44 }
 0x271   : > { %v3718_v14 = vpop.permute.xlu1 %1174  ;;  %v1349_v5 = vpop.permute.xlu0 %1348  ;;  %4065 = vst [vmem:[#allocation13_spill] sm:$0xff] %v3758_v47 }
 0x272   : > { %4064 = vst [vmem:[#allocation12_spill] sm:$0xff] %v3718_v14  ;;  %2666 = vrot.lane.b32.xlu1 %v2665_v1, %s2780_s25  ;;  %v1384_v59 = vadd.f32 %v1349_v5, %v1224_v21 }
 0x275   : > { %v1351_v56 = vpop.permute.xlu1 %1350  ;;  %v1863_v51 = vpop.permute.xlu0 %1862 }
 0x276   : > { %v1385_v44 = vadd.f32 %v1351_v56, %v1225_v10  ;;  %v1898_v35 = vadd.f32 %v1863_v51, %v1802_v19  ;;  %v3772_v56 = vmul.f32 %v3679_v9, %v3429_v37  ;;  %v2732_v10 = vld [vmem:[%s3044_s28 + $0x10] sm:$0xff] }
 0x278   : > { %v2655_v13 = vpack.i.bf16 %v1385_v44, %v1384_v59  ;;  %v3783_v44 = vmul.f32 %v2728_v31, %v3462_v34  ;;  %v1680_v34 = vmul.f32 %v2732_v10, %v3290_v42  ;;  %v2733_v31 = vld [vmem:[%s3044_s28 + $0x18] sm:$0xff] }
 0x279   : > { %v1865_v55 = vpop.permute.xlu1 %1864  ;;  %v1731_v16 = vpop.permute.xlu0 %1730  ;;  %v1681_v59 = vmul.f32 %v2733_v31, %v3306_v22  ;;  %v2734_v31 = vld [vmem:[%s3044_s28 + $0x30] sm:$0xff] }
 0x27a   : > { %v1899_v14 = vadd.f32 %v1865_v55, %v1803_v25  ;;  %2656 = vrot.lane.b32.xlu0 %v2655_v13, %s2780_s25  ;;  %v3749_v25 = vmul.f32 %v3661_v38, %v3420_v48  ;;  %v2731_v48 = vld [vmem:[%s3044_s28 + $0x78] sm:$0xff]  ;;  %4068 = vst [vmem:[#allocation16_spill] sm:$0xff] %v3783_v44 }
 0x27b   : > { %v3768_v38 = vmul.f32 %v2731_v48, %v3444_v53 }
 0x27c   : > { %v2660_v1 = vpack.i.bf16 %v1899_v14, %v1898_v35 }
 0x27d   : > { %v1733_v49 = vpop.permute.xlu1 %1732  ;;  %v3730_v57 = vpop.permute.xlu0 %1734 }
 0x27e   : > { %2661 = vrot.lane.b32.xlu0 %v2660_v1, %s2780_s25  ;;  %v4070_v1 = vsub.f32 %v3505_v33, %v3511_v12  ;;  %v1777_v44 = vsub.f32 %v1681_v59, %v1733_v49 }
 0x281   : > { %v3733_v62 = vpop.permute.xlu1 %1736  ;;  %v3735_v5 = vpop.permute.xlu0 %1738 }
 0x285   : > { %v3741_v21 = vpop.permute.xlu1 %1740  ;;  %v3743_v19 = vpop.permute.xlu0 %1742 }
 0x289   : > { %v3751_v13 = vpop.permute.xlu1 %1744  ;;  %v3753_v14 = vpop.permute.xlu0 %1746 }
 0x28d   : > { %v3760_v43 = vpop.permute.xlu1 %1748  ;;  %v3762_v61 = vpop.permute.xlu0 %1750 }
 0x28e   : > { %4066 = vst [vmem:[#allocation14_spill] sm:$0xff] %v3762_v61 }
 0x291   : > { %v3774_v29 = vpop.permute.xlu1 %1756  ;;  %v3776_v2 = vpop.permute.xlu0 %1754 }
 0x292   : > { %4067 = vst [vmem:[#allocation15_spill] sm:$0xff] %v3776_v2 }
 0x295   : > { %v3785_v53 = vpop.permute.xlu1 %1752 }
 0x296   : > { %4069 = vst [vmem:[#allocation17_spill] sm:$0xff] %v3785_v53  ;;  %v1776_v53 = vsub.f32 %v1680_v34, %v1731_v16 }
 0x299   : > { %v2592_v37 = vpop.permute.xlu1 %2591 }
 0x29a   : > { %v2594_v9 = vunpack.i.h.bf16 %v2592_v37  ;;  %v2593_v48 = vunpack.i.l.bf16 %v2592_v37  ;;  %v4071_v37 = vsub.f32 %v3491_v30, %v3497_v45 }
 0x29c   : > { %v1456_v51 = vsel %vm1452_vm2, %v4070_v1, %v2594_v9  ;;  %v1455_v55 = vsel %vm1452_vm2, %v4071_v37, %v2593_v48 }
 0x29d   : > { %v2403_v35 = vpack.c.bf16 %v1456_v51, %v1456_v51  ;;  %v2402_v61 = vpack.c.bf16 %v1455_v55, %v1455_v55  ;;  %v2597_v47 = vpop.permute.xlu1 %2596  ;;  %v4072_v55 = vsub.f32 %v3544_v58, %v3546_v50  ;;  %v4074_v58 = vsub.f32 %v3571_v54, %v3577_v0  ;;  %v2735_v0 = vld [vmem:[%s3044_s28 + $0x38] sm:$0xff] }
 0x29e   : > { %v2599_v2 = vunpack.i.h.bf16 %v2597_v47  ;;  %v2598_v42 = vunpack.i.l.bf16 %v2597_v47  ;;  %v4073_v47 = vsub.f32 %v3533_v28, %v3537_v6  ;;  %v4075_v28 = vsub.f32 %v3562_v41, %v3564_v46 }
 0x29f   : > { %1536 = vst.msk [vmem:[%s3793_s20 + $0xc] sm:$0xf] %vm858_vm1, %v2403_v35  ;;  %1535 = vst.msk [vmem:[%s3793_s20 + $0x8] sm:$0xf] %vm858_vm1, %v2402_v61  ;;  %v1684_v54 = vmul.f32 %v2734_v31, %v3341_v24  ;;  %v1685_v37 = vmul.f32 %v2735_v0, %v3356_v17  ;;  %v4076_v41 = vsub.f32 %v3588_v15, %v3590_v63 }
 0x2a0   : > { %v1969_v22 = vsel %vm1452_vm2, %v1777_v44, %v2599_v2  ;;  %v1968_v30 = vsel %vm1452_vm2, %v1776_v53, %v2598_v42  ;;  %v2602_v45 = vpop.permute.xlu0 %2601  ;;  %v4077_v42 = vsub.f32 %v3575_v11, %v3579_v8  ;;  %v4080_v31 = vsub.f32 %v3635_v32, %v3637_v40 }
 0x2a1   : > { %v2419_v33 = vpack.c.bf16 %v1969_v22, %v1969_v22  ;;  %v2418_v12 = vpack.c.bf16 %v1968_v30, %v1968_v30  ;;  %v2604_v16 = vunpack.i.h.bf16 %v2602_v45  ;;  %v2603_v49 = vunpack.i.l.bf16 %v2602_v45 }
 0x2a2   : > { %v1780_v24 = vsub.f32 %v1684_v54, %v3735_v5  ;;  %v1781_v17 = vsub.f32 %v1685_v37, %v3741_v21  ;;  %v4081_v0 = vsub.f32 %v3626_v7, %v3628_v20 }
 0x2a3   : > { %2049 = vst.msk [vmem:[%s3815_s23 + $0xc] sm:$0xf] %vm858_vm1, %v2419_v33  ;;  %2048 = vst.msk [vmem:[%s3815_s23 + $0x8] sm:$0xf] %vm858_vm1, %v2418_v12  ;;  %v1454_v35 = vsel %vm1452_vm2, %v4072_v55, %v2604_v16  ;;  %v1453_v61 = vsel %vm1452_vm2, %v4073_v47, %v2603_v49  ;;  %v2736_v55 = vld [vmem:[%s3044_s28 + $0x20] sm:$0xff]  ;;  %v2737_v47 = vld [vmem:[%s3044_s28 + $0x28] sm:$0xff] }
 0x2a4   : > { %v2401_v10 = vpack.c.bf16 %v1454_v35, %v1454_v35  ;;  %v2400_v2 = vpack.c.bf16 %v1453_v61, %v1453_v61  ;;  %v2607_v51 = vpop.permute.xlu0 %2606  ;;  %v1682_v35 = vmul.f32 %v2736_v55, %v3350_v36  ;;  %v1683_v61 = vmul.f32 %v2737_v47, %v3376_v4 }
 0x2a5   : > { %v2609_v59 = vunpack.i.h.bf16 %v2607_v51  ;;  %v2608_v44 = vunpack.i.l.bf16 %v2607_v51  ;;  %v4079_v51 = vsub.f32 %v3602_v60, %v3604_v3  ;;  %v4087_v55 = vsub.f32 %v3749_v25, %v3751_v13  ;;  %v4089_v13 = vld [vmem:[#allocation3_spill] sm:$0xff] }
 0x2a6   : > { %1534 = vst.msk [vmem:[%s3793_s20 + $0x4] sm:$0xf] %vm858_vm1, %v2401_v10  ;;  %1533 = vst.msk [vmem:[%s3793_s20] sm:$0xf] %vm858_vm1, %v2400_v2  ;;  %v4078_v10 = vsub.f32 %v3611_v18, %v3613_v23  ;;  %v1778_v36 = vsub.f32 %v1682_v35, %v3730_v57  ;;  %v1779_v4 = vsub.f32 %v1683_v61, %v3733_v62 }
 0x2a7   : > { %v1967_v50 = vsel %vm1452_vm2, %v4074_v58, %v2609_v59  ;;  %v1966_v6 = vsel %vm1452_vm2, %v4075_v28, %v2608_v44  ;;  %v4088_v35 = vsub.f32 %v3739_v39, %v3743_v19  ;;  %v4092_v19 = vld [vmem:[#allocation6_spill] sm:$0xff] }
 0x2a8   : > { %v2417_v53 = vpack.c.bf16 %v1967_v50, %v1967_v50  ;;  %v2416_v1 = vpack.c.bf16 %v1966_v6, %v1966_v6 }
 0x2aa   : > { %2047 = vst.msk [vmem:[%s3815_s23 + $0x4] sm:$0xf] %vm858_vm1, %v2417_v53  ;;  %2046 = vst.msk [vmem:[%s3815_s23] sm:$0xf] %vm858_vm1, %v2416_v1  ;;  %v2738_v1 = vld [vmem:[%s3044_s28 + $0x50] sm:$0xff] }
 0x2b0   : > { %v2612_v9 = vpop.permute.xlu1 %2611 }
 0x2b1   : > { %v2614_v48 = vunpack.i.h.bf16 %v2612_v9  ;;  %v2613_v34 = vunpack.i.l.bf16 %v2612_v9  ;;  %v1688_v9 = vmul.f32 %v2738_v1, %v3385_v27 }
 0x2b3   : > { %v1460_v46 = vsel %vm1452_vm2, %v4076_v41, %v2614_v48  ;;  %v1459_v22 = vsel %vm1452_vm2, %v4077_v42, %v2613_v34  ;;  %v2739_v48 = vld [vmem:[%s3044_s28 + $0x58] sm:$0xff]  ;;  %v1784_v27 = vsub.f32 %v1688_v9, %v3753_v14 }
 0x2b4   : > { %v2407_v30 = vpack.c.bf16 %v1460_v46, %v1460_v46  ;;  %v2406_v45 = vpack.c.bf16 %v1459_v22, %v1459_v22  ;;  %v2617_v33 = vpop.permute.xlu1 %2616  ;;  %v1689_v34 = vmul.f32 %v2739_v48, %v3400_v52 }
 0x2b5   : > { %v2619_v12 = vunpack.i.h.bf16 %v2617_v33  ;;  %v2618_v15 = vunpack.i.l.bf16 %v2617_v33  ;;  %v4082_v33 = vld [vmem:[#allocation4_spill] sm:$0xff] }
 0x2b6   : > { %1540 = vst.msk [vmem:[%s3793_s20 + $0x1c] sm:$0xf] %vm858_vm1, %v2407_v30  ;;  %1539 = vst.msk [vmem:[%s3793_s20 + $0x18] sm:$0xf] %vm858_vm1, %v2406_v45  ;;  %v1785_v22 = vsub.f32 %v1689_v34, %v3760_v43 }
 0x2b7   : > { %v1973_v11 = vsel %vm1452_vm2, %v1781_v17, %v2619_v12  ;;  %v1972_v8 = vsel %vm1452_vm2, %v1780_v24, %v2618_v15  ;;  %v4083_v24 = vsub.f32 %v3665_v26, %v4082_v33  ;;  %v4084_v12 = vld [vmem:[#allocation2_spill] sm:$0xff]  ;;  %v4085_v15 = vld [vmem:[#allocation5_spill] sm:$0xff] }
 0x2b8   : > { %v2423_v63 = vpack.c.bf16 %v1973_v11, %v1973_v11  ;;  %v2422_v16 = vpack.c.bf16 %v1972_v8, %v1972_v8  ;;  %v4086_v11 = vsub.f32 %v4084_v12, %v4085_v15 }
 0x2ba   : > { %2053 = vst.msk [vmem:[%s3815_s23 + $0x1c] sm:$0xf] %vm858_vm1, %v2423_v63  ;;  %2052 = vst.msk [vmem:[%s3815_s23 + $0x18] sm:$0xf] %vm858_vm1, %v2422_v16 }
 0x2bc   : > { %v2622_v5 = vpop.permute.xlu0 %2621 }
 0x2bd   : > { %v2624_v21 = vunpack.i.h.bf16 %v2622_v5  ;;  %v2623_v49 = vunpack.i.l.bf16 %v2622_v5 }
 0x2bf   : > { %v1458_v2 = vsel %vm1452_vm2, %v4078_v10, %v2624_v21  ;;  %v1457_v59 = vsel %vm1452_vm2, %v4079_v51, %v2623_v49 }
 0x2c0   : > { %v2405_v44 = vpack.c.bf16 %v1458_v2, %v1458_v2  ;;  %v2404_v58 = vpack.c.bf16 %v1457_v59, %v1457_v59  ;;  %v2627_v50 = vpop.permute.xlu0 %2626  ;;  %v4090_v59 = vld [vmem:[#allocation8_spill] sm:$0xff] }
 0x2c1   : > { %v2629_v28 = vunpack.i.h.bf16 %v2627_v50  ;;  %v2628_v18 = vunpack.i.l.bf16 %v2627_v50 }
 0x2c2   : > { %1538 = vst.msk [vmem:[%s3793_s20 + $0x14] sm:$0xf] %vm858_vm1, %v2405_v44  ;;  %1537 = vst.msk [vmem:[%s3793_s20 + $0x10] sm:$0xf] %vm858_vm1, %v2404_v58  ;;  %v4091_v44 = vsub.f32 %v4089_v13, %v4090_v59  ;;  %v4093_v58 = vld [vmem:[#allocation7_spill] sm:$0xff] }
 0x2c3   : > { %v1971_v60 = vsel %vm1452_vm2, %v1779_v4, %v2629_v28  ;;  %v1970_v3 = vsel %vm1452_vm2, %v1778_v36, %v2628_v18  ;;  %v4094_v50 = vsub.f32 %v4092_v19, %v4093_v58 }
 0x2c4   : > { %v2421_v23 = vpack.c.bf16 %v1971_v60, %v1971_v60  ;;  %v2420_v6 = vpack.c.bf16 %v1970_v3, %v1970_v3 }
 0x2c6   : > { %2051 = vst.msk [vmem:[%s3815_s23 + $0x14] sm:$0xf] %vm858_vm1, %v2421_v23  ;;  %2050 = vst.msk [vmem:[%s3815_s23 + $0x10] sm:$0xf] %vm858_vm1, %v2420_v6  ;;  %v4095_v23 = vsub.f32 %v3768_v38, %v3774_v29  ;;  %v4098_v29 = vld [vmem:[#allocation11_spill] sm:$0xff] }
 0x2c8   : > { %v2632_v57 = vpop.permute.xlu1 %2631 }
 0x2c9   : > { %v2634_v62 = vunpack.i.h.bf16 %v2632_v57  ;;  %v2633_v53 = vunpack.i.l.bf16 %v2632_v57  ;;  %v4096_v57 = vld [vmem:[#allocation15_spill] sm:$0xff] }
 0x2cb   : > { %v1464_v54 = vsel %vm1452_vm2, %v4080_v31, %v2634_v62  ;;  %v1463_v37 = vsel %vm1452_vm2, %v4081_v0, %v2633_v53  ;;  %v4097_v62 = vsub.f32 %v3772_v56, %v4096_v57  ;;  %v4099_v31 = vld [vmem:[#allocation12_spill] sm:$0xff]  ;;  %v4101_v0 = vld [vmem:[#allocation9_spill] sm:$0xff] }
 0x2cc   : > { %v2411_v41 = vpack.c.bf16 %v1464_v54, %v1464_v54  ;;  %v2410_v46 = vpack.c.bf16 %v1463_v37, %v1463_v37  ;;  %v2637_v42 = vpop.permute.xlu1 %2636  ;;  %v4100_v54 = vsub.f32 %v4098_v29, %v4099_v31  ;;  %v4102_v37 = vld [vmem:[#allocation10_spill] sm:$0xff] }
 0x2cd   : > { %v2639_v52 = vunpack.i.h.bf16 %v2637_v42  ;;  %v2638_v30 = vunpack.i.l.bf16 %v2637_v42 }
 0x2ce   : > { %1544 = vst.msk [vmem:[%s3793_s20 + $0x2c] sm:$0xf] %vm858_vm1, %v2411_v41  ;;  %1543 = vst.msk [vmem:[%s3793_s20 + $0x28] sm:$0xf] %vm858_vm1, %v2410_v46  ;;  %v4103_v41 = vsub.f32 %v4101_v0, %v4102_v37 }
 0x2cf   : > { %v1977_v32 = vsel %vm1452_vm2, %v1785_v22, %v2639_v52  ;;  %v1976_v7 = vsel %vm1452_vm2, %v1784_v27, %v2638_v30 }
 0x2d0   : > { %v2427_v20 = vpack.c.bf16 %v1977_v32, %v1977_v32  ;;  %v2426_v40 = vpack.c.bf16 %v1976_v7, %v1976_v7  ;;  %v4104_v32 = vld [vmem:[#allocation16_spill] sm:$0xff]  ;;  %v4105_v7 = vld [vmem:[#allocation17_spill] sm:$0xff] }
 0x2d2   : > { %2057 = vst.msk [vmem:[%s3815_s23 + $0x2c] sm:$0xf] %vm858_vm1, %v2427_v20  ;;  %2056 = vst.msk [vmem:[%s3815_s23 + $0x28] sm:$0xf] %vm858_vm1, %v2426_v40  ;;  %v4106_v20 = vsub.f32 %v4104_v32, %v4105_v7 }
 0x2d4   : > { %v2642_v14 = vpop.permute.xlu0 %2641 }
 0x2d5   : > { %v2644_v43 = vunpack.i.h.bf16 %v2642_v14  ;;  %v2643_v45 = vunpack.i.l.bf16 %v2642_v14  ;;  %v4107_v14 = vld [vmem:[#allocation13_spill] sm:$0xff] }
 0x2d7   : > { %v1462_v17 = vsel %vm1452_vm2, %v4083_v24, %v2644_v43  ;;  %v1461_v8 = vsel %vm1452_vm2, %v4086_v11, %v2643_v45  ;;  %v4108_v43 = vld [vmem:[#allocation14_spill] sm:$0xff] }
 0x2d8   : > { %v2409_v63 = vpack.c.bf16 %v1462_v17, %v1462_v17  ;;  %v2408_v16 = vpack.c.bf16 %v1461_v8, %v1461_v8  ;;  %v2647_v5 = vpop.permute.xlu0 %2646  ;;  %v4109_v45 = vsub.f32 %v4107_v14, %v4108_v43 }
 0x2d9   : > { %v2649_v21 = vunpack.i.h.bf16 %v2647_v5  ;;  %v2648_v49 = vunpack.i.l.bf16 %v2647_v5 }
 0x2da   : > { %1542 = vst.msk [vmem:[%s3793_s20 + $0x24] sm:$0xf] %vm858_vm1, %v2409_v63  ;;  %1541 = vst.msk [vmem:[%s3793_s20 + $0x20] sm:$0xf] %vm858_vm1, %v2408_v16 }
 0x2db   : > { %v1975_v26 = vsel %vm1452_vm2, %v4087_v55, %v2649_v21  ;;  %v1974_v47 = vsel %vm1452_vm2, %v4088_v35, %v2648_v49 }
 0x2dc   : > { %v2425_v61 = vpack.c.bf16 %v1975_v26, %v1975_v26  ;;  %v2424_v10 = vpack.c.bf16 %v1974_v47, %v1974_v47 }
 0x2de   : > { %2055 = vst.msk [vmem:[%s3815_s23 + $0x24] sm:$0xf] %vm858_vm1, %v2425_v61  ;;  %2054 = vst.msk [vmem:[%s3815_s23 + $0x20] sm:$0xf] %vm858_vm1, %v2424_v10 }
 0x2e0   : > { %v2652_v2 = vpop.permute.xlu1 %2651 }
 0x2e1   : > { %v2654_v51 = vunpack.i.h.bf16 %v2652_v2  ;;  %v2653_v25 = vunpack.i.l.bf16 %v2652_v2 }
 0x2e3   : > { %v1468_v39 = vsel %vm1452_vm2, %v4091_v44, %v2654_v51  ;;  %v1467_v36 = vsel %vm1452_vm2, %v4094_v50, %v2653_v25 }
 0x2e4   : > { %v2415_v4 = vpack.c.bf16 %v1468_v39, %v1468_v39  ;;  %v2414_v28 = vpack.c.bf16 %v1467_v36, %v1467_v36  ;;  %v2667_v18 = vpop.permute.xlu1 %2666 }
 0x2e5   : > { %v2669_v60 = vunpack.i.h.bf16 %v2667_v18  ;;  %v2668_v3 = vunpack.i.l.bf16 %v2667_v18 }
 0x2e6   : > { %1548 = vst.msk [vmem:[%s3793_s20 + $0x3c] sm:$0xf] %vm858_vm1, %v2415_v4  ;;  %1547 = vst.msk [vmem:[%s3793_s20 + $0x38] sm:$0xf] %vm858_vm1, %v2414_v28 }
 0x2e7   : > { %v1981_v6 = vsel %vm1452_vm2, %v4095_v23, %v2669_v60  ;;  %v1980_v53 = vsel %vm1452_vm2, %v4097_v62, %v2668_v3 }
 0x2e8   : > { %v2431_v1 = vpack.c.bf16 %v1981_v6, %v1981_v6  ;;  %v2430_v9 = vpack.c.bf16 %v1980_v53, %v1980_v53 }
 0x2ea   : > { %2061 = vst.msk [vmem:[%s3815_s23 + $0x3c] sm:$0xf] %vm858_vm1, %v2431_v1  ;;  %2060 = vst.msk [vmem:[%s3815_s23 + $0x38] sm:$0xf] %vm858_vm1, %v2430_v9 }
 0x2ec   : > { %v2657_v48 = vpop.permute.xlu0 %2656 }
 0x2ed   : > { %v2659_v34 = vunpack.i.h.bf16 %v2657_v48  ;;  %v2658_v38 = vunpack.i.l.bf16 %v2657_v48 }
 0x2ef   : > { %v1466_v56 = vsel %vm1452_vm2, %v4100_v54, %v2659_v34  ;;  %v1465_v46 = vsel %vm1452_vm2, %v4103_v41, %v2658_v38 }
 0x2f0   : > { %v2413_v42 = vpack.c.bf16 %v1466_v56, %v1466_v56  ;;  %v2412_v27 = vpack.c.bf16 %v1465_v46, %v1465_v46  ;;  %v2662_v22 = vpop.permute.xlu0 %2661 }
 0x2f1   : > { %v2664_v52 = vunpack.i.h.bf16 %v2662_v22  ;;  %v2663_v30 = vunpack.i.l.bf16 %v2662_v22 }
 0x2f2   : > { %1546 = vst.msk [vmem:[%s3793_s20 + $0x34] sm:$0xf] %vm858_vm1, %v2413_v42  ;;  %1545 = vst.msk [vmem:[%s3793_s20 + $0x30] sm:$0xf] %vm858_vm1, %v2412_v27 }
 0x2f3   : > { %v1979_v40 = vsel %vm1452_vm2, %v4106_v20, %v2664_v52  ;;  %v1978_v33 = vsel %vm1452_vm2, %v4109_v45, %v2663_v30 }
 0x2f4   : > { %v2429_v24 = vpack.c.bf16 %v1979_v40, %v1979_v40  ;;  %v2428_v17 = vpack.c.bf16 %v1978_v33, %v1978_v33 }
 0x2f6   : > { %2059 = vst.msk [vmem:[%s3815_s23 + $0x34] sm:$0xf] %vm858_vm1, %v2429_v24  ;;  %2058 = vst.msk [vmem:[%s3815_s23 + $0x30] sm:$0xf] %vm858_vm1, %v2428_v17 }
 0x2f7 PF: > { %s20_s13 = sadd.s32 1, %s2778_s13   ;;  %s4110_s30 = smov %s2770_s11 }
 0x2f8   : > { %p17_p7 = scmp.ge.s32.totalorder %s20_s13, 6   ;;  %s4111_s10 = smov %s2774_s12 }
 0x2f9   : > { %s4112_s11 = smov %s4115_s14  ;;  %s4113_s12 = smov %s4119_s15 }
 0x2fa   :  { %19 = sbr.rel (!%p17_p7) target bundleno = 3 (0x3), region = 108 }

</bundles_post_ra>
